<compile_context>
chip_gen: v7x
topology: tpu7x:2x2x1
jax: 0.10.0
libtpu: 0.0.40
codegen_flags: <defaults>
</compile_context>

<pallas_src>
import numpy as np
import jax
import jax.numpy as jnp
from jax import lax
from jax.experimental import pallas as pl
from jax.experimental.pallas import tpu as pltpu

# ----------------------------------------------------------------------------
# Model dimensions (consistent with the module's __init__).
# ----------------------------------------------------------------------------
DECISION_DIM = 8          # input one-hot / decision dimension
MAX_LEN = 40              # sequence length
LATENT_DIM = 16
HIDDEN = 435

K1, C1_OUT = 9, 9
K2, C2_OUT = 9, 9
K3, C3_OUT = 11, 10
L0, C0 = MAX_LEN, DECISION_DIM
L1 = L0 - K1 + 1                        # 32
L2 = L1 - K2 + 1                        # 24
L3 = L2 - K3 + 1                        # 14  == last_conv_size
F0 = C0 * L0                            # 320  flattened input
F1 = C1_OUT * L1                        # 288
F2 = C2_OUT * L2                        # 216
F3 = C3_OUT * L3                        # 140  == last_conv_size * 10
HEAD = 2 * LATENT_DIM                   # 32   fused mean/log_var head

DEFAULT_TB = 256                        # batch tile per grid step


def _round_up(v, m):
    return (v + m - 1) // m * m


# ----------------------------------------------------------------------------
# Pallas kernel: TB samples per grid step, 5 batched matmuls, fused heads.
# ----------------------------------------------------------------------------
def _cnn_encoder_kernel(x_ref, w1_ref, b1_ref, w2_ref, b2_ref, w3_ref, b3_ref,
                        wfc_ref, bfc_ref, wh_ref, bh_ref, out_ref):
    h = x_ref[...]                                                   # (TB, F0)
    # conv1 + relu  (block-Toeplitz matmul)
    h = jnp.maximum(
        jnp.dot(h, w1_ref[...], preferred_element_type=jnp.float32) + b1_ref[...], 0.0)
    # conv2 + relu
    h = jnp.maximum(
        jnp.dot(h, w2_ref[...], preferred_element_type=jnp.float32) + b2_ref[...], 0.0)
    # conv3 + relu   (output is already PyTorch's channel-major flatten)
    h = jnp.maximum(
        jnp.dot(h, w3_ref[...], preferred_element_type=jnp.float32) + b3_ref[...], 0.0)
    # fully-connected w1 + relu
    h = jnp.maximum(
        jnp.dot(h, wfc_ref[...], preferred_element_type=jnp.float32) + bfc_ref[...], 0.0)
    # fused latent heads: [mean | log_var]
    out_ref[...] = (
        jnp.dot(h, wh_ref[...], preferred_element_type=jnp.float32) + bh_ref[...])


# ----------------------------------------------------------------------------
# Wrapper: layout conversion, batch tiling/padding, pallas_call plumbing.
# ----------------------------------------------------------------------------
def cnn_encoder_forward(x_ncw, kernel_params, *, block_b=DEFAULT_TB):
    """x_ncw: (N, DECISION_DIM, MAX_LEN) float32, like the PyTorch module."""
    n = x_ncw.shape[0]
    # Channel-major flatten (index = c*MAX_LEN + t) — a pure reshape of NCW.
    x_flat = x_ncw.reshape(n, F0).astype(jnp.float32)

    tb = min(block_b, _round_up(n, 8))
    n_pad = _round_up(n, tb)
    if n_pad != n:
        x_flat = jnp.pad(x_flat, ((0, n_pad - n), (0, 0)))

    weights = list(kernel_params)                                    # 10 arrays, all 2-D

    in_specs = [pl.BlockSpec((tb, F0), lambda i: (i, 0))]
    in_specs += [pl.BlockSpec(w.shape, lambda i: (0, 0)) for w in weights]
    out_specs = pl.BlockSpec((tb, HEAD), lambda i: (i, 0))
    out_shape = jax.ShapeDtypeStruct((n_pad, HEAD), jnp.float32)

    out = pl.pallas_call(
        _cnn_encoder_kernel,
        grid=(n_pad // tb,),
        in_specs=in_specs,
        out_specs=out_specs,
        out_shape=out_shape,
        compiler_params=pltpu.CompilerParams(
            dimension_semantics=("parallel",)),
    )(x_flat, *weights)

    out = out[:n]
    return out[:, :LATENT_DIM], out[:, LATENT_DIM:]


# ----------------------------------------------------------------------------
# Deterministic parameter init (PyTorch-shaped), then convert to kernel layout.
# ----------------------------------------------------------------------------
def init_torch_params(key):
    ks = jax.random.split(key, 10)
    s = 0.05
    p = {
        "conv1_w": jax.random.normal(ks[0], (C1_OUT, DECISION_DIM, K1), jnp.float32) * s,
        "conv1_b": jax.random.normal(ks[1], (C1_OUT,), jnp.float32) * s,
        "conv2_w": jax.random.normal(ks[2], (C2_OUT, C1_OUT, K2), jnp.float32) * s,
        "conv2_b": jax.random.normal(ks[3], (C2_OUT,), jnp.float32) * s,
        "conv3_w": jax.random.normal(ks[4], (C3_OUT, C2_OUT, K3), jnp.float32) * s,
        "conv3_b": jax.random.normal(ks[5], (C3_OUT,), jnp.float32) * s,
        "w1_w": jax.random.normal(ks[6], (HIDDEN, F3), jnp.float32) * s,
        "w1_b": jax.random.normal(ks[7], (HIDDEN,), jnp.float32) * s,
        "mean_w": jax.random.normal(ks[8], (LATENT_DIM, HIDDEN), jnp.float32) * s,
        "mean_b": jnp.zeros((LATENT_DIM,), jnp.float32),
        "logvar_w": jax.random.normal(ks[9], (LATENT_DIM, HIDDEN), jnp.float32) * s,
        "logvar_b": jnp.zeros((LATENT_DIM,), jnp.float32),
    }
    return p


def _conv1d_as_matmul(w, b, l_in, l_out):
    """Fold a valid Conv1d (C_out, C_in, K) into a block-Toeplitz matrix
    mapping channel-major flat input (C_in*L_in) to channel-major flat output
    (C_out*L_out):  out[co*L_out + l] = sum_{ci,k} in[ci*L_in + l + k] * w[co,ci,k].
    """
    w = np.asarray(w, np.float32)
    b = np.asarray(b, np.float32)
    c_out, c_in, k = w.shape
    big = np.zeros((c_in * l_in, c_out * l_out), np.float32)
    for co in range(c_out):
        for ci in range(c_in):
            for l in range(l_out):
                big[ci * l_in + l: ci * l_in + l + k, co * l_out + l] = w[co, ci]
    b_big = np.repeat(b, l_out)                       # index co*l_out + l
    return jnp.asarray(big), jnp.asarray(b_big)[None, :]


def torch_to_kernel_params(p):
    w1, b1 = _conv1d_as_matmul(p["conv1_w"], p["conv1_b"], L0, L1)
    w2, b2 = _conv1d_as_matmul(p["conv2_w"], p["conv2_b"], L1, L2)
    w3, b3 = _conv1d_as_matmul(p["conv3_w"], p["conv3_b"], L2, L3)
    # Layer-3 output flat index is c*L3 + l == PyTorch's h3.view(N, -1), so the
    # Linear weight is used directly (transposed to (F3, HIDDEN)).
    wfc = jnp.asarray(p["w1_w"]).T                    # (F3, HIDDEN)
    bfc = jnp.asarray(p["w1_b"])[None, :]             # (1, HIDDEN)
    # Fused heads: [mean | log_var].
    wh = jnp.concatenate([jnp.asarray(p["mean_w"]).T,
                          jnp.asarray(p["logvar_w"]).T], axis=1)     # (HIDDEN, 32)
    bh = jnp.concatenate([p["mean_b"], p["logvar_b"]])[None, :]      # (1, 32)
    return (w1, b1, w2, b2, w3, b3, wfc, bfc, wh, bh)


# ----------------------------------------------------------------------------
# Pure-JAX reference (mirrors the PyTorch forward, NCW layout) for validation.
# ----------------------------------------------------------------------------
def reference_forward(x_ncw, p):
    dn = ("NCH", "OIH", "NCH")
    h1 = lax.conv_general_dilated(x_ncw, p["conv1_w"], (1,), "VALID",
                                  dimension_numbers=dn)
    h1 = jnp.maximum(h1 + p["conv1_b"][None, :, None], 0.0)
    h2 = lax.conv_general_dilated(h1, p["conv2_w"], (1,), "VALID",
                                  dimension_numbers=dn)
    h2 = jnp.maximum(h2 + p["conv2_b"][None, :, None], 0.0)
    h3 = lax.conv_general_dilated(h2, p["conv3_w"], (1,), "VALID",
                                  dimension_numbers=dn)
    h3 = jnp.maximum(h3 + p["conv3_b"][None, :, None], 0.0)
    flat = h3.reshape(x_ncw.shape[0], -1)             # (N, 10*L3), channel-major
    h = jnp.maximum(flat @ p["w1_w"].T + p["w1_b"], 0.0)
    z_mean = h @ p["mean_w"].T + p["mean_b"]
    z_log_var = h @ p["logvar_w"].T + p["logvar_b"]
    return z_mean, z_log_var


if __name__ == "__main__":
    key = jax.random.PRNGKey(0)
    k_x, k_x2, k_p = jax.random.split(key, 3)

    torch_params = init_torch_params(k_p)
    kernel_params = torch_to_kernel_params(torch_params)

    # --- small batch (matches the module's (N, DECISION_DIM, max_len) input) --
    N = 2
    x = jax.random.normal(k_x, (N, DECISION_DIM, MAX_LEN), jnp.float32)
    z_mean, z_log_var = cnn_encoder_forward(x, kernel_params)
    jax.block_until_ready((z_mean, z_log_var))

    ref_mean, ref_log_var = reference_forward(x, torch_params)
    np.testing.assert_allclose(np.asarray(z_mean), np.asarray(ref_mean),
                               rtol=5e-4, atol=5e-4)
    np.testing.assert_allclose(np.asarray(z_log_var), np.asarray(ref_log_var),
                               rtol=5e-4, atol=5e-4)
    assert z_mean.shape == (N, LATENT_DIM) and z_log_var.shape == (N, LATENT_DIM)

    # --- odd batch, multi-block grid + padding path ---------------------------
    N2 = 37
    x2 = jax.random.normal(k_x2, (N2, DECISION_DIM, MAX_LEN), jnp.float32)
    z_mean2, z_log_var2 = cnn_encoder_forward(x2, kernel_params, block_b=16)
    jax.block_until_ready((z_mean2, z_log_var2))

    ref_mean2, ref_log_var2 = reference_forward(x2, torch_params)
    np.testing.assert_allclose(np.asarray(z_mean2), np.asarray(ref_mean2),
                               rtol=5e-4, atol=5e-4)
    np.testing.assert_allclose(np.asarray(z_log_var2), np.asarray(ref_log_var2),
                               rtol=5e-4, atol=5e-4)
    assert z_mean2.shape == (N2, LATENT_DIM) and z_log_var2.shape == (N2, LATENT_DIM)

    print("KERNEL_OK")
</pallas_src>

<mosaic_0001>
module attributes {stable_mosaic.version = 11 : i64} {
  func.func @_cnn_encoder_kernel(%arg0: i32, %arg1: memref<8x320xf32, #tpu.memory_space<vmem>>, %arg2: memref<320x288xf32, #tpu.memory_space<vmem>>, %arg3: memref<1x288xf32, #tpu.memory_space<vmem>>, %arg4: memref<288x216xf32, #tpu.memory_space<vmem>>, %arg5: memref<1x216xf32, #tpu.memory_space<vmem>>, %arg6: memref<216x140xf32, #tpu.memory_space<vmem>>, %arg7: memref<1x140xf32, #tpu.memory_space<vmem>>, %arg8: memref<140x435xf32, #tpu.memory_space<vmem>>, %arg9: memref<1x435xf32, #tpu.memory_space<vmem>>, %arg10: memref<435x32xf32, #tpu.memory_space<vmem>>, %arg11: memref<1x32xf32, #tpu.memory_space<vmem>>, %arg12: memref<8x32xf32, #tpu.memory_space<vmem>>) attributes {dimension_semantics = [#tpu.dimension_semantics<parallel>], iteration_bounds = array<i64: 1>, scalar_prefetch = 0 : i64, scratch_operands = 0 : i64, tpu.core_type = #tpu.core_type<tc>, window_params = [{transform_indices = @transform_0, window_bounds = array<i64: 8, 320>}, {pipeline_mode = #tpu.pipeline_mode<synchronous>, transform_indices = @transform_1, window_bounds = array<i64: 320, 288>}, {pipeline_mode = #tpu.pipeline_mode<synchronous>, transform_indices = @transform_2, window_bounds = array<i64: 1, 288>}, {pipeline_mode = #tpu.pipeline_mode<synchronous>, transform_indices = @transform_3, window_bounds = array<i64: 288, 216>}, {pipeline_mode = #tpu.pipeline_mode<synchronous>, transform_indices = @transform_4, window_bounds = array<i64: 1, 216>}, {pipeline_mode = #tpu.pipeline_mode<synchronous>, transform_indices = @transform_5, window_bounds = array<i64: 216, 140>}, {pipeline_mode = #tpu.pipeline_mode<synchronous>, transform_indices = @transform_6, window_bounds = array<i64: 1, 140>}, {pipeline_mode = #tpu.pipeline_mode<synchronous>, transform_indices = @transform_7, window_bounds = array<i64: 140, 435>}, {pipeline_mode = #tpu.pipeline_mode<synchronous>, transform_indices = @transform_8, window_bounds = array<i64: 1, 435>}, {pipeline_mode = #tpu.pipeline_mode<synchronous>, transform_indices = @transform_9, window_bounds = array<i64: 435, 32>}, {pipeline_mode = #tpu.pipeline_mode<synchronous>, transform_indices = @transform_10, window_bounds = array<i64: 1, 32>}, {transform_indices = @transform_11, window_bounds = array<i64: 8, 32>}]} {
    %c0 = arith.constant 0 : index
    %c0_0 = arith.constant 0 : index
    %0 = vector.load %arg1[%c0, %c0_0] : memref<8x320xf32, #tpu.memory_space<vmem>>, vector<8x320xf32>
    %c0_1 = arith.constant 0 : index
    %c0_2 = arith.constant 0 : index
    %1 = vector.load %arg2[%c0_1, %c0_2] : memref<320x288xf32, #tpu.memory_space<vmem>>, vector<320x288xf32>
    %cst = arith.constant dense<0.000000e+00> : vector<8x288xf32>
    %2 = tpu.matmul %0, %1, %cst {dimension_numbers = #tpu.dot_dimension_numbers<[1], [0], [0], [1], [0, 0, 1, 1], [], []>} : vector<8x320xf32>, vector<320x288xf32>, vector<8x288xf32> -> vector<8x288xf32>
    %c0_3 = arith.constant 0 : index
    %c0_4 = arith.constant 0 : index
    %3 = vector.load %arg3[%c0_3, %c0_4] : memref<1x288xf32, #tpu.memory_space<vmem>>, vector<1x288xf32>
    %4 = vector.broadcast %3 : vector<1x288xf32> to vector<8x288xf32>
    %5 = arith.addf %2, %4 : vector<8x288xf32>
    %cst_5 = arith.constant 0.000000e+00 : f32
    %6 = vector.broadcast %cst_5 : f32 to vector<8x288xf32>
    %7 = arith.maximumf %5, %6 : vector<8x288xf32>
    %c0_6 = arith.constant 0 : index
    %c0_7 = arith.constant 0 : index
    %8 = vector.load %arg4[%c0_6, %c0_7] : memref<288x216xf32, #tpu.memory_space<vmem>>, vector<288x216xf32>
    %cst_8 = arith.constant dense<0.000000e+00> : vector<8x216xf32>
    %9 = tpu.matmul %7, %8, %cst_8 {dimension_numbers = #tpu.dot_dimension_numbers<[1], [0], [0], [1], [0, 0, 1, 1], [], []>} : vector<8x288xf32>, vector<288x216xf32>, vector<8x216xf32> -> vector<8x216xf32>
    %c0_9 = arith.constant 0 : index
    %c0_10 = arith.constant 0 : index
    %10 = vector.load %arg5[%c0_9, %c0_10] : memref<1x216xf32, #tpu.memory_space<vmem>>, vector<1x216xf32>
    %11 = vector.broadcast %10 : vector<1x216xf32> to vector<8x216xf32>
    %12 = arith.addf %9, %11 : vector<8x216xf32>
    %cst_11 = arith.constant 0.000000e+00 : f32
    %13 = vector.broadcast %cst_11 : f32 to vector<8x216xf32>
    %14 = arith.maximumf %12, %13 : vector<8x216xf32>
    %c0_12 = arith.constant 0 : index
    %c0_13 = arith.constant 0 : index
    %15 = vector.load %arg6[%c0_12, %c0_13] : memref<216x140xf32, #tpu.memory_space<vmem>>, vector<216x140xf32>
    %cst_14 = arith.constant dense<0.000000e+00> : vector<8x140xf32>
    %16 = tpu.matmul %14, %15, %cst_14 {dimension_numbers = #tpu.dot_dimension_numbers<[1], [0], [0], [1], [0, 0, 1, 1], [], []>} : vector<8x216xf32>, vector<216x140xf32>, vector<8x140xf32> -> vector<8x140xf32>
    %c0_15 = arith.constant 0 : index
    %c0_16 = arith.constant 0 : index
    %17 = vector.load %arg7[%c0_15, %c0_16] : memref<1x140xf32, #tpu.memory_space<vmem>>, vector<1x140xf32>
    %18 = vector.broadcast %17 : vector<1x140xf32> to vector<8x140xf32>
    %19 = arith.addf %16, %18 : vector<8x140xf32>
    %cst_17 = arith.constant 0.000000e+00 : f32
    %20 = vector.broadcast %cst_17 : f32 to vector<8x140xf32>
    %21 = arith.maximumf %19, %20 : vector<8x140xf32>
    %c0_18 = arith.constant 0 : index
    %c0_19 = arith.constant 0 : index
    %22 = vector.load %arg8[%c0_18, %c0_19] : memref<140x435xf32, #tpu.memory_space<vmem>>, vector<140x435xf32>
    %cst_20 = arith.constant dense<0.000000e+00> : vector<8x435xf32>
    %23 = tpu.matmul %21, %22, %cst_20 {dimension_numbers = #tpu.dot_dimension_numbers<[1], [0], [0], [1], [0, 0, 1, 1], [], []>} : vector<8x140xf32>, vector<140x435xf32>, vector<8x435xf32> -> vector<8x435xf32>
    %c0_21 = arith.constant 0 : index
    %c0_22 = arith.constant 0 : index
    %24 = vector.load %arg9[%c0_21, %c0_22] : memref<1x435xf32, #tpu.memory_space<vmem>>, vector<1x435xf32>
    %25 = vector.broadcast %24 : vector<1x435xf32> to vector<8x435xf32>
    %26 = arith.addf %23, %25 : vector<8x435xf32>
    %cst_23 = arith.constant 0.000000e+00 : f32
    %27 = vector.broadcast %cst_23 : f32 to vector<8x435xf32>
    %28 = arith.maximumf %26, %27 : vector<8x435xf32>
    %c0_24 = arith.constant 0 : index
    %c0_25 = arith.constant 0 : index
    %29 = vector.load %arg10[%c0_24, %c0_25] : memref<435x32xf32, #tpu.memory_space<vmem>>, vector<435x32xf32>
    %cst_26 = arith.constant dense<0.000000e+00> : vector<8x32xf32>
    %30 = tpu.matmul %28, %29, %cst_26 {dimension_numbers = #tpu.dot_dimension_numbers<[1], [0], [0], [1], [0, 0, 1, 1], [], []>} : vector<8x435xf32>, vector<435x32xf32>, vector<8x32xf32> -> vector<8x32xf32>
    %c0_27 = arith.constant 0 : index
    %c0_28 = arith.constant 0 : index
    %31 = vector.load %arg11[%c0_27, %c0_28] : memref<1x32xf32, #tpu.memory_space<vmem>>, vector<1x32xf32>
    %32 = vector.broadcast %31 : vector<1x32xf32> to vector<8x32xf32>
    %33 = arith.addf %30, %32 : vector<8x32xf32>
    %c0_29 = arith.constant 0 : index
    %c0_30 = arith.constant 0 : index
    %34 = vector.load %arg12[%c0_29, %c0_30] : memref<8x32xf32, #tpu.memory_space<vmem>>, vector<8x32xf32>
    tpu.vector_store %arg12[%c0_29, %c0_30], %33 {strides = array<i32>} : memref<8x32xf32, #tpu.memory_space<vmem>>, vector<8x32xf32>,
    return
  }
  func.func @transform_0(%arg0: i32) -> (i32, i32) {
    %c0_i32 = arith.constant 0 : i32
    %c0_i32_0 = arith.constant 0 : i32
    return %arg0, %c0_i32 : i32, i32
  }
  func.func @transform_1(%arg0: i32) -> (i32, i32) {
    %c0_i32 = arith.constant 0 : i32
    %c0_i32_0 = arith.constant 0 : i32
    %c0_i32_1 = arith.constant 0 : i32
    return %c0_i32, %c0_i32_0 : i32, i32
  }
  func.func @transform_2(%arg0: i32) -> (i32, i32) {
    %c0_i32 = arith.constant 0 : i32
    %c0_i32_0 = arith.constant 0 : i32
    %c0_i32_1 = arith.constant 0 : i32
    return %c0_i32, %c0_i32_0 : i32, i32
  }
  func.func @transform_3(%arg0: i32) -> (i32, i32) {
    %c0_i32 = arith.constant 0 : i32
    %c0_i32_0 = arith.constant 0 : i32
    %c0_i32_1 = arith.constant 0 : i32
    return %c0_i32, %c0_i32_0 : i32, i32
  }
  func.func @transform_4(%arg0: i32) -> (i32, i32) {
    %c0_i32 = arith.constant 0 : i32
    %c0_i32_0 = arith.constant 0 : i32
    %c0_i32_1 = arith.constant 0 : i32
    return %c0_i32, %c0_i32_0 : i32, i32
  }
  func.func @transform_5(%arg0: i32) -> (i32, i32) {
    %c0_i32 = arith.constant 0 : i32
    %c0_i32_0 = arith.constant 0 : i32
    %c0_i32_1 = arith.constant 0 : i32
    return %c0_i32, %c0_i32_0 : i32, i32
  }
  func.func @transform_6(%arg0: i32) -> (i32, i32) {
    %c0_i32 = arith.constant 0 : i32
    %c0_i32_0 = arith.constant 0 : i32
    %c0_i32_1 = arith.constant 0 : i32
    return %c0_i32, %c0_i32_0 : i32, i32
  }
  func.func @transform_7(%arg0: i32) -> (i32, i32) {
    %c0_i32 = arith.constant 0 : i32
    %c0_i32_0 = arith.constant 0 : i32
    %c0_i32_1 = arith.constant 0 : i32
    return %c0_i32, %c0_i32_0 : i32, i32
  }
  func.func @transform_8(%arg0: i32) -> (i32, i32) {
    %c0_i32 = arith.constant 0 : i32
    %c0_i32_0 = arith.constant 0 : i32
    %c0_i32_1 = arith.constant 0 : i32
    return %c0_i32, %c0_i32_0 : i32, i32
  }
  func.func @transform_9(%arg0: i32) -> (i32, i32) {
    %c0_i32 = arith.constant 0 : i32
    %c0_i32_0 = arith.constant 0 : i32
    %c0_i32_1 = arith.constant 0 : i32
    return %c0_i32, %c0_i32_0 : i32, i32
  }
  func.func @transform_10(%arg0: i32) -> (i32, i32) {
    %c0_i32 = arith.constant 0 : i32
    %c0_i32_0 = arith.constant 0 : i32
    %c0_i32_1 = arith.constant 0 : i32
    return %c0_i32, %c0_i32_0 : i32, i32
  }
  func.func @transform_11(%arg0: i32) -> (i32, i32) {
    %c0_i32 = arith.constant 0 : i32
    %c0_i32_0 = arith.constant 0 : i32
    return %arg0, %c0_i32 : i32, i32
  }
}

</mosaic_0001>

<bundles_post_ra>
// kernel: tpu_custom_call.1
= control target key start
LH: loop header
LB: loop body
LE: loop exit
PB: predicated region body
PF: predicated region fallthrough
CT: control target
= control target key end

     0   :  { %v1862_v7 = vmov 0.0   ;;  %vm179_vm0 = vcmask 523264   ;;  %s3131_s0 = inlined_call_operand.vmem [shape: f32[8,320], index: 0, kind: input, shape index: {}]   ;;  %s3132_s1 = inlined_call_operand.vmem [shape: f32[320,288], index: 1, kind: input, shape index: {}]   ;;  %s3133_s2 = inlined_call_operand.vmem [shape: f32[1,288], index: 2, kind: input, shape index: {}]   ;;  %s3134_s3 = inlined_call_operand.vmem [shape: f32[288,216], index: 3, kind: input, shape index: {}]   ;;  %s3135_s4 = inlined_call_operand.vmem [shape: f32[1,216], index: 4, kind: input, shape index: {}]   ;;  %s3136_s5 = inlined_call_operand.vmem [shape: f32[216,140], index: 5, kind: input, shape index: {}]   ;;  %s3137_s6 = inlined_call_operand.vmem [shape: f32[1,140], index: 6, kind: input, shape index: {}]   ;;  %s3138_s7 = inlined_call_operand.vmem [shape: f32[140,435], index: 7, kind: input, shape index: {}]   ;;  %s3139_s8 = inlined_call_operand.vmem [shape: f32[1,435], index: 8, kind: input, shape index: {}]   ;;  %s3140_s9 = inlined_call_operand.vmem [shape: f32[435,32], index: 9, kind: input, shape index: {}]   ;;  %s3141_s10 = inlined_call_operand.vmem [shape: f32[1,32], index: 10, kind: input, shape index: {}]   ;;  %s3142_s11 = inlined_call_operand.hbm [shape: f32[8,32], index: 11, kind: output, shape index: {}]  }
   0x1   :  { %v43_v0 = vld [vmem:[%s3132_s1 + $0x8] sm:$0xff]  ;;  %v46_v1 = vld [vmem:[%s3132_s1 + $0x20] sm:$0xff]  ;;  %v45_v4 = vld [vmem:[%s3132_s1 + $0x18] sm:$0xff]  ;;  %318 = vmatprep.mubr.f32.mxu1 %v1862_v7 }
   0x2   :  { %v42_v2 = vld [vmem:[%s3132_s1] sm:$0xff]  ;;  %v1436_v3 = vpack.c.bf16 %v46_v1, %v43_v0  ;;  %v139_v5 = vld [vmem:[%s3132_s1 + $0x308] sm:$0xff]  ;;  %v141_v11 = vld [vmem:[%s3132_s1 + $0x318] sm:$0xff] }
   0x3   :  { %v142_v6 = vld [vmem:[%s3132_s1 + $0x320] sm:$0xff]  ;;  %v1438_v8 = vpack.c.bf16 %v45_v4, %v42_v2  ;;  %v49_v12 = vld [vmem:[%s3132_s1 + $0x38] sm:$0xff]  ;;  %v52_v14 = vld [vmem:[%s3132_s1 + $0x50] sm:$0xff] }
   0x4   :  { %v1500_v9 = vpack.c.bf16 %v142_v6, %v139_v5  ;;  %v138_v10 = vld [vmem:[%s3132_s1 + $0x300] sm:$0xff]  ;;  %1437 = vmatprep.subr.bf16.mxu0 %v1436_v3  ;;  %v48_v15 = vld [vmem:[%s3132_s1 + $0x30] sm:$0xff]  ;;  %v51_v16 = vld [vmem:[%s3132_s1 + $0x48] sm:$0xff]  ;;  %v1440_v17 = vpack.c.bf16 %v52_v14, %v49_v12 }
   0x5   :  { %v1502_v13 = vpack.c.bf16 %v141_v11, %v138_v10  ;;  %1439 = vmatpush1.bf16.msra.mxu0 %v1438_v8  ;;  %v1442_v18 = vpack.c.bf16 %v51_v16, %v48_v15  ;;  %v145_v19 = vld [vmem:[%s3132_s1 + $0x338] sm:$0xff]  ;;  %v148_v20 = vld [vmem:[%s3132_s1 + $0x350] sm:$0xff]  ;;  %v147_v23 = vld [vmem:[%s3132_s1 + $0x348] sm:$0xff] }
   0x6   :  { %1501 = vmatprep.subr.bf16.mxu1 %v1500_v9  ;;  %v144_v21 = vld [vmem:[%s3132_s1 + $0x330] sm:$0xff]  ;;  %v1504_v22 = vpack.c.bf16 %v148_v20, %v145_v19  ;;  %v55_v24 = vld [vmem:[%s3132_s1 + $0x68] sm:$0xff]  ;;  %v58_v25 = vld [vmem:[%s3132_s1 + $0x80] sm:$0xff]  ;;  %1441 = vmatprep.subr.bf16.mxu0 %v1440_v17 }
   0x7   :  { %1503 = vmatpush1.bf16.msra.mxu1 %v1502_v13  ;;  %v1506_v26 = vpack.c.bf16 %v147_v23, %v144_v21  ;;  %v1444_v27 = vpack.c.bf16 %v58_v25, %v55_v24  ;;  %v54_v28 = vld [vmem:[%s3132_s1 + $0x60] sm:$0xff]  ;;  %v57_v29 = vld [vmem:[%s3132_s1 + $0x78] sm:$0xff]  ;;  %v151_v30 = vld [vmem:[%s3132_s1 + $0x368] sm:$0xff] }
   0x8   :  { %1505 = vmatprep.subr.bf16.mxu1 %v1504_v22  ;;  %v154_v31 = vld [vmem:[%s3132_s1 + $0x380] sm:$0xff]  ;;  %v153_v33 = vld [vmem:[%s3132_s1 + $0x378] sm:$0xff]  ;;  %v1446_v34 = vpack.c.bf16 %v57_v29, %v54_v28  ;;  %v64_v37 = vld [vmem:[%s3132_s1 + $0xb0] sm:$0xff] }
   0x9   :  { %v150_v32 = vld [vmem:[%s3132_s1 + $0x360] sm:$0xff]  ;;  %1443 = vmatpush1.bf16.msra.mxu0 %v1442_v18  ;;  %v1508_v35 = vpack.c.bf16 %v154_v31, %v151_v30  ;;  %v61_v36 = vld [vmem:[%s3132_s1 + $0x98] sm:$0xff]  ;;  %v60_v38 = vld [vmem:[%s3132_s1 + $0x90] sm:$0xff] }
   0xa   :  { %1445 = vmatprep.subr.bf16.mxu0 %v1444_v27  ;;  %v1510_v39 = vpack.c.bf16 %v153_v33, %v150_v32  ;;  %v1448_v40 = vpack.c.bf16 %v64_v37, %v61_v36  ;;  %v63_v41 = vld [vmem:[%s3132_s1 + $0xa8] sm:$0xff]  ;;  %v157_v42 = vld [vmem:[%s3132_s1 + $0x398] sm:$0xff]  ;;  %v160_v43 = vld [vmem:[%s3132_s1 + $0x3b0] sm:$0xff] }
   0xb   :  { %1507 = vmatpush1.bf16.msra.mxu1 %v1506_v26  ;;  %v1512_v44 = vpack.c.bf16 %v160_v43, %v157_v42  ;;  %v156_v45 = vld [vmem:[%s3132_s1 + $0x390] sm:$0xff]  ;;  %v159_v46 = vld [vmem:[%s3132_s1 + $0x3a8] sm:$0xff]  ;;  %v70_v48 = vld [vmem:[%s3132_s1 + $0xe0] sm:$0xff]  ;;  %v1450_v49 = vpack.c.bf16 %v63_v41, %v60_v38 }
   0xc   :  { %1509 = vmatprep.subr.bf16.mxu1 %v1508_v35  ;;  %v67_v47 = vld [vmem:[%s3132_s1 + $0xc8] sm:$0xff]  ;;  %v92_v50 = vld [vmem:[%s3132_s1 + $0x190] sm:$0xff]  ;;  %v1514_v52 = vpack.c.bf16 %v159_v46, %v156_v45  ;;  %v66_v54 = vld [vmem:[%s3132_s1 + $0xc0] sm:$0xff] }
   0xd   :  { %1447 = vmatpush1.bf16.msra.mxu0 %v1446_v34  ;;  %v95_v51 = vld [vmem:[%s3132_s1 + $0x1a8] sm:$0xff]  ;;  %v1452_v53 = vpack.c.bf16 %v70_v48, %v67_v47  ;;  %v69_v55 = vld [vmem:[%s3132_s1 + $0xd8] sm:$0xff]  ;;  %v44_v56 = vld [vmem:[%s3132_s1 + $0x10] sm:$0xff] }
   0xe   :  { %1449 = vmatprep.subr.bf16.mxu0 %v1448_v40  ;;  %v1516_v57 = vpack.c.bf16 %v95_v51, %v92_v50  ;;  %v47_v58 = vld [vmem:[%s3132_s1 + $0x28] sm:$0xff]  ;;  %v73_v59 = vld [vmem:[%s3132_s1 + $0xf8] sm:$0xff]  ;;  %v76_v60 = vld [vmem:[%s3132_s1 + $0x110] sm:$0xff]  ;;  %v1454_v63 = vpack.c.bf16 %v69_v55, %v66_v54 }
   0xf   :  { %1511 = vmatpush1.bf16.msra.mxu1 %v1510_v39  ;;  %v98_v61 = vld [vmem:[%s3132_s1 + $0x1c0] sm:$0xff]  ;;  %v101_v62 = vld [vmem:[%s3132_s1 + $0x1d8] sm:$0xff]  ;;  %v2063_v0 = vld [vmem:[%s3131_s0 + $0x10] sm:$0xff]  ;;  %v1518_v1 = vpack.c.bf16 %v47_v58, %v44_v56  ;;  %v1456_v2 = vpack.c.bf16 %v76_v60, %v73_v59 }
  0x10   :  { %1513 = vmatprep.subr.bf16.mxu1 %v1512_v44  ;;  %v72_v3 = vld [vmem:[%s3132_s1 + $0xf0] sm:$0xff]  ;;  %v75_v4 = vld [vmem:[%s3132_s1 + $0x108] sm:$0xff]  ;;  %v50_v5 = vld [vmem:[%s3132_s1 + $0x40] sm:$0xff]  ;;  %v1520_v6 = vpack.c.bf16 %v101_v62, %v98_v61 }
  0x11   :  { %1451 = vmatpush1.bf16.msra.mxu0 %v1450_v49  ;;  %v53_v8 = vld [vmem:[%s3132_s1 + $0x58] sm:$0xff]  ;;  %v79_v9 = vld [vmem:[%s3132_s1 + $0x128] sm:$0xff]  ;;  %v82_v10 = vld [vmem:[%s3132_s1 + $0x140] sm:$0xff]  ;;  %v1458_v13 = vpack.c.bf16 %v75_v4, %v72_v3 }
  0x12   :  { %1453 = vmatprep.subr.bf16.mxu0 %v1452_v53  ;;  %v104_v11 = vld [vmem:[%s3132_s1 + $0x1f0] sm:$0xff]  ;;  %v107_v12 = vld [vmem:[%s3132_s1 + $0x208] sm:$0xff]  ;;  %v1522_v14 = vpack.c.bf16 %v53_v8, %v50_v5  ;;  %v1460_v15 = vpack.c.bf16 %v82_v10, %v79_v9  ;;  %v78_v16 = vld [vmem:[%s3132_s1 + $0x120] sm:$0xff] }
  0x13   :  { %1515 = vmatpush1.bf16.msra.mxu1 %v1514_v52  ;;  %v81_v17 = vld [vmem:[%s3132_s1 + $0x138] sm:$0xff]  ;;  %v56_v18 = vld [vmem:[%s3132_s1 + $0x70] sm:$0xff]  ;;  %v1524_v19 = vpack.c.bf16 %v107_v12, %v104_v11  ;;  %v59_v20 = vld [vmem:[%s3132_s1 + $0x88] sm:$0xff] }
  0x14   :  { %1517 = vmatprep.subr.bf16.mxu1 %v1516_v57  ;;  %v85_v21 = vld [vmem:[%s3132_s1 + $0x158] sm:$0xff]  ;;  %v88_v22 = vld [vmem:[%s3132_s1 + $0x170] sm:$0xff]  ;;  %v110_v23 = vld [vmem:[%s3132_s1 + $0x220] sm:$0xff]  ;;  %v1462_v25 = vpack.c.bf16 %v81_v17, %v78_v16  ;;  %v1526_v26 = vpack.c.bf16 %v59_v20, %v56_v18 }
  0x15   :  { %1455 = vmatpush1.bf16.msra.mxu0 %v1454_v63  ;;  %v113_v24 = vld [vmem:[%s3132_s1 + $0x238] sm:$0xff]  ;;  %v1464_v27 = vpack.c.bf16 %v88_v22, %v85_v21  ;;  %v84_v28 = vld [vmem:[%s3132_s1 + $0x150] sm:$0xff]  ;;  %v87_v29 = vld [vmem:[%s3132_s1 + $0x168] sm:$0xff] }
  0x16   :  { %1325 = vmatmul.mubr.msk.f32.vlgmr.msra.gmra.mrb[0].mxu1 %vm179_vm0, %v2063_v0  ;;  %1457 = vmatprep.subr.bf16.mxu0 %v1456_v2  ;;  %v62_v30 = vld [vmem:[%s3132_s1 + $0xa0] sm:$0xff]  ;;  %v1528_v31 = vpack.c.bf16 %v113_v24, %v110_v23  ;;  %v65_v32 = vld [vmem:[%s3132_s1 + $0xb8] sm:$0xff]  ;;  %v91_v33 = vld [vmem:[%s3132_s1 + $0x188] sm:$0xff]  ;;  %v1466_v37 = vpack.c.bf16 %v87_v29, %v84_v28 }
  0x17   :  { %1519 = vmatpush3.bf16.msra.mxu1 %v1518_v1  ;;  %v94_v34 = vld [vmem:[%s3132_s1 + $0x1a0] sm:$0xff]  ;;  %v116_v35 = vld [vmem:[%s3132_s1 + $0x250] sm:$0xff]  ;;  %v119_v36 = vld [vmem:[%s3132_s1 + $0x268] sm:$0xff]  ;;  %v1530_v38 = vpack.c.bf16 %v65_v32, %v62_v30 }
  0x18   :  { %1521 = vmatprep.subr.bf16.mxu1 %v1520_v6  ;;  %v1468_v39 = vpack.c.bf16 %v94_v34, %v91_v33  ;;  %v90_v40 = vld [vmem:[%s3132_s1 + $0x180] sm:$0xff]  ;;  %v93_v41 = vld [vmem:[%s3132_s1 + $0x198] sm:$0xff]  ;;  %v68_v42 = vld [vmem:[%s3132_s1 + $0xd0] sm:$0xff]  ;;  %v1532_v43 = vpack.c.bf16 %v119_v36, %v116_v35 }
  0x19   :  { %1459 = vmatpush1.bf16.msra.mxu0 %v1458_v13  ;;  %v71_v44 = vld [vmem:[%s3132_s1 + $0xe8] sm:$0xff]  ;;  %v97_v45 = vld [vmem:[%s3132_s1 + $0x1b8] sm:$0xff]  ;;  %v100_v46 = vld [vmem:[%s3132_s1 + $0x1d0] sm:$0xff]  ;;  %v1470_v49 = vpack.c.bf16 %v93_v41, %v90_v40 }
  0x1a   :  { %1461 = vmatprep.subr.bf16.mxu0 %v1460_v15  ;;  %v122_v47 = vld [vmem:[%s3132_s1 + $0x280] sm:$0xff]  ;;  %v125_v48 = vld [vmem:[%s3132_s1 + $0x298] sm:$0xff]  ;;  %v96_v50 = vld [vmem:[%s3132_s1 + $0x1b0] sm:$0xff]  ;;  %v1534_v51 = vpack.c.bf16 %v71_v44, %v68_v42  ;;  %v1472_v52 = vpack.c.bf16 %v100_v46, %v97_v45 }
  0x1b   :  { %1523 = vmatpush3.bf16.msra.mxu1 %v1522_v14  ;;  %v99_v53 = vld [vmem:[%s3132_s1 + $0x1c8] sm:$0xff]  ;;  %v74_v54 = vld [vmem:[%s3132_s1 + $0x100] sm:$0xff]  ;;  %v1536_v56 = vpack.c.bf16 %v125_v48, %v122_v47  ;;  %v77_v57 = vld [vmem:[%s3132_s1 + $0x118] sm:$0xff] }
  0x1c   :  { %1525 = vmatprep.subr.bf16.mxu1 %v1524_v19  ;;  %v40_v55 = vld [vmem:[%s3131_s0 + $0x8] sm:$0xff]  ;;  %v106_v59 = vld [vmem:[%s3132_s1 + $0x200] sm:$0xff]  ;;  %v128_v60 = vld [vmem:[%s3132_s1 + $0x2b0] sm:$0xff]  ;;  %v1474_v62 = vpack.c.bf16 %v99_v53, %v96_v50  ;;  %v1538_v63 = vpack.c.bf16 %v77_v57, %v74_v54 }
  0x1d   :  { %1463 = vmatpush1.bf16.msra.mxu0 %v1462_v25  ;;  %v103_v58 = vld [vmem:[%s3132_s1 + $0x1e8] sm:$0xff]  ;;  %389 = vmatprep.mubr.f32.mxu1 %v40_v55  ;;  %v102_v2 = vld [vmem:[%s3132_s1 + $0x1e0] sm:$0xff]  ;;  %v105_v3 = vld [vmem:[%s3132_s1 + $0x1f8] sm:$0xff] }
  0x1e   :  { %1465 = vmatprep.subr.bf16.mxu0 %v1464_v27  ;;  %v131_v61 = vld [vmem:[%s3132_s1 + $0x2c8] sm:$0xff]  ;;  %247 = vmatprep.mubr.f32.mxu0 %v40_v55  ;;  %v1476_v1 = vpack.c.bf16 %v106_v59, %v103_v58  ;;  %v80_v4 = vld [vmem:[%s3132_s1 + $0x130] sm:$0xff]  ;;  %v109_v8 = vld [vmem:[%s3132_s1 + $0x218] sm:$0xff]  ;;  %v1478_v12 = vpack.c.bf16 %v105_v3, %v102_v2 }
  0x1f   :  { %1527 = vmatpush3.bf16.msra.mxu1 %v1526_v26  ;;  %v1540_v5 = vpack.c.bf16 %v131_v61, %v128_v60  ;;  %v83_v6 = vld [vmem:[%s3132_s1 + $0x148] sm:$0xff]  ;;  %v112_v9 = vld [vmem:[%s3132_s1 + $0x230] sm:$0xff]  ;;  %v134_v10 = vld [vmem:[%s3132_s1 + $0x2e0] sm:$0xff] }
  0x20   :  { %1529 = vmatprep.subr.bf16.mxu1 %v1528_v31  ;;  %v137_v11 = vld [vmem:[%s3132_s1 + $0x2f8] sm:$0xff]  ;;  %v1542_v13 = vpack.c.bf16 %v83_v6, %v80_v4  ;;  %v1480_v14 = vpack.c.bf16 %v112_v9, %v109_v8  ;;  %v108_v15 = vld [vmem:[%s3132_s1 + $0x210] sm:$0xff]  ;;  %v111_v16 = vld [vmem:[%s3132_s1 + $0x228] sm:$0xff] }
  0x21   :  { %1467 = vmatpush1.bf16.msra.mxu0 %v1466_v37  ;;  %v86_v17 = vld [vmem:[%s3132_s1 + $0x160] sm:$0xff]  ;;  %v1544_v18 = vpack.c.bf16 %v137_v11, %v134_v10  ;;  %v89_v19 = vld [vmem:[%s3132_s1 + $0x178] sm:$0xff]  ;;  %v115_v20 = vld [vmem:[%s3132_s1 + $0x248] sm:$0xff]  ;;  %v1482_v22 = vpack.c.bf16 %v111_v16, %v108_v15 }
  0x22   :  { %1469 = vmatprep.subr.bf16.mxu0 %v1468_v39  ;;  %v118_v21 = vld [vmem:[%s3132_s1 + $0x260] sm:$0xff]  ;;  %v1546_v23 = vpack.c.bf16 %v89_v19, %v86_v17  ;;  %v117_v26 = vld [vmem:[%s3132_s1 + $0x258] sm:$0xff]  ;;  %v140_v27 = vld [vmem:[%s3132_s1 + $0x310] sm:$0xff] }
  0x23   :  { %1531 = vmatpush3.bf16.msra.mxu1 %v1530_v38  ;;  %v1484_v24 = vpack.c.bf16 %v118_v21, %v115_v20  ;;  %v114_v25 = vld [vmem:[%s3132_s1 + $0x240] sm:$0xff]  ;;  %v143_v28 = vld [vmem:[%s3132_s1 + $0x328] sm:$0xff]  ;;  %v121_v29 = vld [vmem:[%s3132_s1 + $0x278] sm:$0xff] }
  0x24   :  { %1533 = vmatprep.subr.bf16.mxu1 %v1532_v43  ;;  %v124_v30 = vld [vmem:[%s3132_s1 + $0x290] sm:$0xff] }
  0x25   :  { %1471 = vmatpush1.bf16.msra.mxu0 %v1470_v49 }
  0x26   :  { %1473 = vmatprep.subr.bf16.mxu0 %v1472_v52 }
  0x27   :  { %1535 = vmatpush3.bf16.msra.mxu1 %v1534_v51 }
  0x28   :  { %1537 = vmatprep.subr.bf16.mxu1 %v1536_v56 }
  0x29   :  { %1475 = vmatpush1.bf16.msra.mxu0 %v1474_v62 }
  0x2a   :  { %1477 = vmatprep.subr.bf16.mxu0 %v1476_v1 }
  0x2b   :  { %1539 = vmatpush3.bf16.msra.mxu1 %v1538_v63 }
  0x2c   :  { %1541 = vmatprep.subr.bf16.mxu1 %v1540_v5 }
  0x2d   :  { %1479 = vmatpush1.bf16.msra.mxu0 %v1478_v12 }
  0x2e   :  { %1481 = vmatprep.subr.bf16.mxu0 %v1480_v14 }
  0x2f   :  { %1543 = vmatpush3.bf16.msra.mxu1 %v1542_v13 }
  0x30   :  { %1545 = vmatprep.subr.bf16.mxu1 %v1544_v18 }
  0x31   :  { %16 = vsyncpa [#allocation3], 0  ;;  %1483 = vmatpush1.bf16.msra.mxu0 %v1482_v22  ;;  %v1486_v31 = vpack.c.bf16 %v117_v26, %v114_v25  ;;  %v39_v32 = vld [vmem:[%s3131_s0] sm:$0xff]  ;;  %v1549_v33 = vpack.c.bf16 %v143_v28, %v140_v27  ;;  %v1488_v34 = vpack.c.bf16 %v124_v30, %v121_v29  ;;  %v120_v35 = vld [vmem:[%s3132_s1 + $0x270] sm:$0xff]  ;;  %v1863_v38 = vmov 0.0|0.0   ;;  %s1866_s16 = smov [#allocation2]  }
  0x32   :  { %1485 = vmatprep.subr.bf16.mxu0 %v1484_v24  ;;  %v123_v36 = vld [vmem:[%s3132_s1 + $0x288] sm:$0xff]  ;;  %v146_v37 = vld [vmem:[%s3132_s1 + $0x340] sm:$0xff]  ;;  %v149_v39 = vld [vmem:[%s3132_s1 + $0x358] sm:$0xff]  ;;  %vm1864_vm1 = vmmov 0   ;;  %vm552_vm2 = vcmask 261120   ;;  %vm766_vm3 = vcmask 719872  }
  0x33   :  { %1547 = vmatpush3.bf16.msra.mxu1 %v1546_v23  ;;  %v127_v40 = vld [vmem:[%s3132_s1 + $0x2a8] sm:$0xff]  ;;  %v130_v41 = vld [vmem:[%s3132_s1 + $0x2c0] sm:$0xff]  ;;  %v1490_v42 = vpack.c.bf16 %v123_v36, %v120_v35  ;;  %v1552_v43 = vpack.c.bf16 %v149_v39, %v146_v37  ;;  %v129_v46 = vld [vmem:[%s3132_s1 + $0x2b8] sm:$0xff]  ;;  %vm941_vm4 = vcmask 1043456   ;;  %vm1865_vm5 = vmmov 1   ;;  %s1317_s17 = sshll.u32 %s1866_s16, 4  ;;  %s1318_s17 = int_to_ptr.vmem [resolvable:$true] %s1317_s17 }
  0x34   :  { %1548 = vmatprep.subr.bf16.mxu1 %v1863_v38  ;;  %v1492_v44 = vpack.c.bf16 %v130_v41, %v127_v40  ;;  %v126_v45 = vld [vmem:[%s3132_s1 + $0x2a0] sm:$0xff]  ;;  %v152_v47 = vld [vmem:[%s3132_s1 + $0x370] sm:$0xff]  ;;  %v155_v48 = vld [vmem:[%s3132_s1 + $0x388] sm:$0xff]  ;;  %vm937_vm7 = vcmask 97280   ;;  %vm1166_vm8 = vcmask 1042432   ;;  %vm1162_vm9 = vcmask 416768   ;;  %p1843_p1 = scmp.lt.s32.totalorder %s1318_s17, %s1318_s17 }
  0x35   :  { %1487 = vmatpush1.bf16.msra.mxu0 %v1486_v31  ;;  %v133_v49 = vld [vmem:[%s3132_s1 + $0x2d8] sm:$0xff]  ;;  %v136_v50 = vld [vmem:[%s3132_s1 + $0x2f0] sm:$0xff]  ;;  %v1494_v51 = vpack.c.bf16 %v129_v46, %v126_v45  ;;  %v1555_v52 = vpack.c.bf16 %v155_v48, %v152_v47  ;;  %v135_v55 = vld [vmem:[%s3132_s1 + $0x2e8] sm:$0xff]  ;;  %s1838_s18 = scalar_lea.vmem %s1318_s17, 128 }
  0x36   :  { %390 = vmatmul.mubr.f32.vlgmr.msra.gmra.mrb[2].mxu1 %v39_v32  ;;  %1489 = vmatprep.subr.bf16.mxu0 %v1488_v34  ;;  %v1496_v53 = vpack.c.bf16 %v136_v50, %v133_v49  ;;  %v132_v54 = vld [vmem:[%s3132_s1 + $0x2d0] sm:$0xff]  ;;  %v158_v56 = vld [vmem:[%s3132_s1 + $0x3a0] sm:$0xff]  ;;  %v161_v57 = vld [vmem:[%s3132_s1 + $0x3b8] sm:$0xff]  ;;  %p1839_p0 = scmp.ne.s32.totalorder %s1318_s17, %s1838_s18  ;;  %p1844_p2 = scmp.lt.s32.totalorder %s1838_s18, %s1838_s18 }
  0x37   :  { %1550 = vmatpush3.bf16.msra.mxu1 %v1549_v33  ;;  %1433 = vmatprep.mubr.msk.f32.mxu1 %vm1864_vm1, %v1862_v7  ;;  %v469_v58 = vld [vmem:[%s3134_s3 + $0x8] sm:$0xff]  ;;  %v471_v59 = vld [vmem:[%s3134_s3 + $0x18] sm:$0xff]  ;;  %v1498_v60 = vpack.c.bf16 %v135_v55, %v132_v54  ;;  %v1558_v61 = vpack.c.bf16 %v161_v57, %v158_v56  ;;  %v468_v63 = vld [vmem:[%s3134_s3] sm:$0xff] }
  0x38   :  { %1551 = vmatprep.subr.bf16.mxu1 %v1863_v38  ;;  %v1560_v62 = vpack.c.bf16 %v471_v59, %v469_v58  ;;  %v470_v1 = vld [vmem:[%s3134_s3 + $0x10] sm:$0xff]  ;;  %v473_v2 = vld [vmem:[%s3134_s3 + $0x28] sm:$0xff]  ;;  %v475_v3 = vld [vmem:[%s3134_s3 + $0x38] sm:$0xff]  ;;  %p1845_p3 = por %p1844_p2, %p1843_p1 }
  0x39   :  { %1491 = vmatpush1.bf16.msra.mxu0 %v1490_v42  ;;  %v1562_v4 = vpack.c.bf16 %v470_v1, %v468_v63  ;;  %v1564_v5 = vpack.c.bf16 %v475_v3, %v473_v2  ;;  %v472_v6 = vld [vmem:[%s3134_s3 + $0x20] sm:$0xff]  ;;  %v474_v8 = vld [vmem:[%s3134_s3 + $0x30] sm:$0xff]  ;;  %v477_v9 = vld [vmem:[%s3134_s3 + $0x48] sm:$0xff] }
  0x3a   :  { %1493 = vmatprep.subr.bf16.mxu0 %v1492_v44  ;;  %v479_v10 = vld [vmem:[%s3134_s3 + $0x58] sm:$0xff]  ;;  %v1566_v11 = vpack.c.bf16 %v474_v8, %v472_v6  ;;  %v476_v13 = vld [vmem:[%s3134_s3 + $0x40] sm:$0xff]  ;;  %v478_v14 = vld [vmem:[%s3134_s3 + $0x50] sm:$0xff]  ;;  %p1846_p4 = pnand %p1845_p3, %p1839_p0 }
  0x3b   :  { %1553 = vmatpush3.bf16.msra.mxu1 %v1552_v43  ;;  %v1568_v12 = vpack.c.bf16 %v479_v10, %v477_v9  ;;  %v481_v15 = vld [vmem:[%s3134_s3 + $0x68] sm:$0xff]  ;;  %v1570_v16 = vpack.c.bf16 %v478_v14, %v476_v13  ;;  %v480_v18 = vld [vmem:[%s3134_s3 + $0x60] sm:$0xff]  ;;  %v482_v19 = vld [vmem:[%s3134_s3 + $0x70] sm:$0xff] }
  0x3c   :  { %1554 = vmatprep.subr.bf16.mxu1 %v1863_v38  ;;  %v485_v20 = vld [vmem:[%s3134_s3 + $0x88] sm:$0xff]  ;;  %v487_v21 = vld [vmem:[%s3134_s3 + $0x98] sm:$0xff]  ;;  %v1574_v22 = vpack.c.bf16 %v482_v19, %v480_v18  ;;  %v484_v24 = vld [vmem:[%s3134_s3 + $0x80] sm:$0xff] }
  0x3d   :  { %1495 = vmatpush1.bf16.msra.mxu0 %v1494_v51  ;;  %v1576_v23 = vpack.c.bf16 %v487_v21, %v485_v20  ;;  %v486_v25 = vld [vmem:[%s3134_s3 + $0x90] sm:$0xff]  ;;  %v489_v27 = vld [vmem:[%s3134_s3 + $0xa8] sm:$0xff]  ;;  %v491_v28 = vld [vmem:[%s3134_s3 + $0xb8] sm:$0xff] }
  0x3e   :  { %1497 = vmatprep.subr.bf16.mxu0 %v1496_v53  ;;  %v1578_v26 = vpack.c.bf16 %v486_v25, %v484_v24  ;;  %v1580_v29 = vpack.c.bf16 %v491_v28, %v489_v27  ;;  %v488_v30 = vld [vmem:[%s3134_s3 + $0xa0] sm:$0xff]  ;;  %v490_v31 = vld [vmem:[%s3134_s3 + $0xb0] sm:$0xff]  ;;  %v495_v34 = vld [vmem:[%s3134_s3 + $0xd8] sm:$0xff] }
  0x3f   :  { %1556 = vmatpush3.bf16.msra.mxu1 %v1555_v52  ;;  %v1582_v33 = vpack.c.bf16 %v490_v31, %v488_v30  ;;  %v492_v35 = vld [vmem:[%s3134_s3 + $0xc0] sm:$0xff]  ;;  %v494_v36 = vld [vmem:[%s3134_s3 + $0xd0] sm:$0xff]  ;;  %v497_v39 = vld [vmem:[%s3134_s3 + $0xe8] sm:$0xff] }
  0x40   :  { %1557 = vmatprep.subr.bf16.mxu1 %v1863_v38  ;;  %v499_v40 = vld [vmem:[%s3134_s3 + $0xf8] sm:$0xff]  ;;  %v1586_v41 = vpack.c.bf16 %v494_v36, %v492_v35  ;;  %v496_v43 = vld [vmem:[%s3134_s3 + $0xe0] sm:$0xff]  ;;  %v498_v44 = vld [vmem:[%s3134_s3 + $0xf0] sm:$0xff] }
  0x41   :  { %1499 = vmatpush1.bf16.msra.mxu0 %v1498_v60  ;;  %v1588_v42 = vpack.c.bf16 %v499_v40, %v497_v39  ;;  %v501_v45 = vld [vmem:[%s3134_s3 + $0x108] sm:$0xff]  ;;  %v503_v46 = vld [vmem:[%s3134_s3 + $0x118] sm:$0xff]  ;;  %v1590_v47 = vpack.c.bf16 %v498_v44, %v496_v43  ;;  %v500_v49 = vld [vmem:[%s3134_s3 + $0x100] sm:$0xff] }
  0x42   :  { %v1592_v48 = vpack.c.bf16 %v503_v46, %v501_v45  ;;  %v502_v50 = vld [vmem:[%s3134_s3 + $0x110] sm:$0xff]  ;;  %v505_v51 = vld [vmem:[%s3134_s3 + $0x128] sm:$0xff]  ;;  %v507_v52 = vld [vmem:[%s3134_s3 + $0x138] sm:$0xff] }
  0x43   :  { %1559 = vmatpush3.bf16.msra.mxu1 %v1558_v61  ;;  %v1594_v53 = vpack.c.bf16 %v502_v50, %v500_v49  ;;  %v1596_v54 = vpack.c.bf16 %v507_v52, %v505_v51  ;;  %v504_v55 = vld [vmem:[%s3134_s3 + $0x120] sm:$0xff]  ;;  %v506_v56 = vld [vmem:[%s3134_s3 + $0x130] sm:$0xff]  ;;  %v509_v57 = vld [vmem:[%s3134_s3 + $0x148] sm:$0xff] }
  0x44   :  { %1561 = vmatprep.subr.bf16.mxu1 %v1560_v62  ;;  %248 = vmatmul.mubr.f32.vlgmr.msra.gmra.mrb[0].mxu0 %v39_v32  ;;  %v493_v32 = vld [vmem:[%s3134_s3 + $0xc8] sm:$0xff]  ;;  %v511_v58 = vld [vmem:[%s3134_s3 + $0x158] sm:$0xff]  ;;  %v1598_v59 = vpack.c.bf16 %v506_v56, %v504_v55  ;;  %v508_v61 = vld [vmem:[%s3134_s3 + $0x140] sm:$0xff] }
  0x45   :  { %v1584_v37 = vpack.c.bf16 %v495_v34, %v493_v32  ;;  %v1600_v60 = vpack.c.bf16 %v511_v58, %v509_v57  ;;  %v510_v62 = vld [vmem:[%s3134_s3 + $0x150] sm:$0xff]  ;;  %v513_v63 = vld [vmem:[%s3134_s3 + $0x168] sm:$0xff]  ;;  %v515_v1 = vld [vmem:[%s3134_s3 + $0x178] sm:$0xff] }
  0x46   :  { %1434 = vmatmul.mubr.msk.f32.vlgmr.msra.gmra.mrb[4].mxu1 %vm179_vm0, %v2063_v0  ;;  %v483_v0 = vld [vmem:[%s3134_s3 + $0x78] sm:$0xff]  ;;  %v1602_v2 = vpack.c.bf16 %v510_v62, %v508_v61  ;;  %v1604_v3 = vpack.c.bf16 %v515_v1, %v513_v63  ;;  %v517_v6 = vld [vmem:[%s3134_s3 + $0x188] sm:$0xff]  ;;  %v528_v28 = vld [vmem:[%s3134_s3 + $0x1e0] sm:$0xff] }
  0x47   :  { %1563 = vmatpush1.bf16.msra.mxu1 %v1562_v4  ;;  %v1572_v17 = vpack.c.bf16 %v483_v0, %v481_v15  ;;  %v512_v4 = vld [vmem:[%s3134_s3 + $0x160] sm:$0xff]  ;;  %v519_v8 = vld [vmem:[%s3134_s3 + $0x198] sm:$0xff]  ;;  %v521_v14 = vld [vmem:[%s3134_s3 + $0x1a8] sm:$0xff] }
  0x48   :  { %1565 = vmatprep.subr.bf16.mxu1 %v1564_v5  ;;  %v514_v5 = vld [vmem:[%s3134_s3 + $0x170] sm:$0xff]  ;;  %v1608_v10 = vpack.c.bf16 %v519_v8, %v517_v6  ;;  %v523_v15 = vld [vmem:[%s3134_s3 + $0x1b8] sm:$0xff]  ;;  %v525_v19 = vld [vmem:[%s3134_s3 + $0x1c8] sm:$0xff] }
  0x49   :  { %v1606_v9 = vpack.c.bf16 %v514_v5, %v512_v4  ;;  %v1612_v0 = vpack.c.bf16 %v523_v15, %v521_v14  ;;  %v527_v20 = vld [vmem:[%s3134_s3 + $0x1d8] sm:$0xff]  ;;  %v529_v25 = vld [vmem:[%s3134_s3 + $0x1e8] sm:$0xff]  ;;  %v700_v36 = vld [vmem:[%s3136_s5] sm:$0xff] }
  0x4a   :  { %v1616_v21 = vpack.c.bf16 %v527_v20, %v525_v19  ;;  %v533_v31 = vld [vmem:[%s3134_s3 + $0x208] sm:$0xff]  ;;  %v535_v32 = vld [vmem:[%s3134_s3 + $0x218] sm:$0xff]  ;;  %v702_v39 = vld [vmem:[%s3136_s5 + $0x10] sm:$0xff] }
  0x4b   :  { %1567 = vmatpush1.bf16.msra.mxu1 %v1566_v11  ;;  %v516_v11 = vld [vmem:[%s3134_s3 + $0x180] sm:$0xff]  ;;  %v701_v34 = vld [vmem:[%s3136_s5 + $0x8] sm:$0xff]  ;;  %v703_v35 = vld [vmem:[%s3136_s5 + $0x18] sm:$0xff] }
  0x4c   :  { %1569 = vmatprep.subr.bf16.mxu1 %v1568_v12  ;;  %v518_v12 = vld [vmem:[%s3134_s3 + $0x190] sm:$0xff]  ;;  %v705_v40 = vld [vmem:[%s3136_s5 + $0x28] sm:$0xff]  ;;  %v704_v44 = vld [vmem:[%s3136_s5 + $0x20] sm:$0xff] }
  0x4d   :  { %v1610_v13 = vpack.c.bf16 %v518_v12, %v516_v11  ;;  %v706_v45 = vld [vmem:[%s3136_s5 + $0x30] sm:$0xff]  ;;  %v709_v46 = vld [vmem:[%s3136_s5 + $0x48] sm:$0xff]  ;;  %v708_v50 = vld [vmem:[%s3136_s5 + $0x40] sm:$0xff] }
  0x4e   :  { %v710_v51 = vld [vmem:[%s3136_s5 + $0x50] sm:$0xff]  ;;  %v713_v52 = vld [vmem:[%s3136_s5 + $0x68] sm:$0xff]  ;;  %v712_v56 = vld [vmem:[%s3136_s5 + $0x60] sm:$0xff] }
  0x4f   :  { %1571 = vmatpush1.bf16.msra.mxu1 %v1570_v16  ;;  %v520_v16 = vld [vmem:[%s3134_s3 + $0x1a0] sm:$0xff]  ;;  %v714_v57 = vld [vmem:[%s3136_s5 + $0x70] sm:$0xff]  ;;  %v717_v58 = vld [vmem:[%s3136_s5 + $0x88] sm:$0xff] }
  0x50   :  { %1573 = vmatprep.subr.bf16.mxu1 %v1572_v17  ;;  %v522_v17 = vld [vmem:[%s3134_s3 + $0x1b0] sm:$0xff]  ;;  %v716_v62 = vld [vmem:[%s3136_s5 + $0x80] sm:$0xff]  ;;  %v721_v1 = vld [vmem:[%s3136_s5 + $0xa8] sm:$0xff] }
  0x51   :  { %v1614_v18 = vpack.c.bf16 %v522_v17, %v520_v16  ;;  %v718_v63 = vld [vmem:[%s3136_s5 + $0x90] sm:$0xff]  ;;  %v720_v5 = vld [vmem:[%s3136_s5 + $0xa0] sm:$0xff]  ;;  %v725_v8 = vld [vmem:[%s3136_s5 + $0xc8] sm:$0xff] }
  0x52   :  { %v722_v6 = vld [vmem:[%s3136_s5 + $0xb0] sm:$0xff]  ;;  %v724_v12 = vld [vmem:[%s3136_s5 + $0xc0] sm:$0xff]  ;;  %v729_v14 = vld [vmem:[%s3136_s5 + $0xe8] sm:$0xff] }
  0x53   :  { %1575 = vmatpush1.bf16.msra.mxu1 %v1574_v22  ;;  %v524_v22 = vld [vmem:[%s3134_s3 + $0x1c0] sm:$0xff]  ;;  %v731_v15 = vld [vmem:[%s3136_s5 + $0xf8] sm:$0xff]  ;;  %v733_v19 = vld [vmem:[%s3136_s5 + $0x108] sm:$0xff] }
  0x54   :  { %1577 = vmatprep.subr.bf16.mxu1 %v1576_v23  ;;  %v526_v23 = vld [vmem:[%s3134_s3 + $0x1d0] sm:$0xff]  ;;  %v1660_v16 = vpack.c.bf16 %v731_v15, %v729_v14  ;;  %v728_v17 = vld [vmem:[%s3136_s5 + $0xe0] sm:$0xff]  ;;  %v735_v20 = vld [vmem:[%s3136_s5 + $0x118] sm:$0xff] }
  0x55   :  { %v1618_v24 = vpack.c.bf16 %v526_v23, %v524_v22  ;;  %v1664_v22 = vpack.c.bf16 %v735_v20, %v733_v19  ;;  %v732_v23 = vld [vmem:[%s3136_s5 + $0x100] sm:$0xff]  ;;  %v751_v19 = vld [vmem:[%s3136_s5 + $0x198] sm:$0xff]  ;;  %vm1717_vm6 = vmpackc.low %vm941_vm4, %vm1865_vm5 }
  0x56   :  { %v536_v15 = vld [vmem:[%s3134_s3 + $0x220] sm:$0xff] }
  0x57   :  { %1579 = vmatpush1.bf16.msra.mxu1 %v1578_v26  ;;  %v531_v26 = vld [vmem:[%s3134_s3 + $0x1f8] sm:$0xff] }
  0x58   :  { %1581 = vmatprep.subr.bf16.mxu1 %v1580_v29  ;;  %v1620_v27 = vpack.c.bf16 %v531_v26, %v529_v25  ;;  %v530_v29 = vld [vmem:[%s3134_s3 + $0x1f0] sm:$0xff]  ;;  %v737_v25 = vld [vmem:[%s3136_s5 + $0x128] sm:$0xff]  ;;  %v739_v26 = vld [vmem:[%s3136_s5 + $0x138] sm:$0xff] }
  0x59   :  { %v1622_v30 = vpack.c.bf16 %v530_v29, %v528_v28  ;;  %v1668_v28 = vpack.c.bf16 %v739_v26, %v737_v25  ;;  %v736_v29 = vld [vmem:[%s3136_s5 + $0x120] sm:$0xff]  ;;  %v844_v26 = vld [vmem:[%s3138_s7 + $0x8] sm:$0xff] }
  0x5a   :  { %v752_v25 = vld [vmem:[%s3136_s5 + $0x1a0] sm:$0xff] }
  0x5b   :  { %1583 = vmatpush1.bf16.msra.mxu1 %v1582_v33  ;;  %v1624_v33 = vpack.c.bf16 %v535_v32, %v533_v31  ;;  %v741_v31 = vld [vmem:[%s3136_s5 + $0x148] sm:$0xff]  ;;  %v743_v32 = vld [vmem:[%s3136_s5 + $0x158] sm:$0xff] }
  0x5c   :  { %1585 = vmatprep.subr.bf16.mxu1 %v1584_v37  ;;  %v1632_v37 = vpack.c.bf16 %v703_v35, %v701_v34  ;;  %v1672_v34 = vpack.c.bf16 %v743_v32, %v741_v31  ;;  %v740_v35 = vld [vmem:[%s3136_s5 + $0x140] sm:$0xff] }
  0x5d   :  { %v843_v31 = vld [vmem:[%s3138_s7] sm:$0xff] }
  0x5e   :  { %1633 = vmatprep.subr.bf16.mxu0 %v1632_v37  ;;  %v745_v37 = vld [vmem:[%s3136_s5 + $0x168] sm:$0xff]  ;;  %v847_v32 = vld [vmem:[%s3138_s7 + $0x20] sm:$0xff] }
  0x5f   :  { %1587 = vmatpush1.bf16.msra.mxu1 %v1586_v41  ;;  %v707_v41 = vld [vmem:[%s3136_s5 + $0x38] sm:$0xff] }
  0x60   :  { %1589 = vmatprep.subr.bf16.mxu1 %v1588_v42  ;;  %v1634_v42 = vpack.c.bf16 %v702_v39, %v700_v36  ;;  %v1636_v43 = vpack.c.bf16 %v707_v41, %v705_v40  ;;  %v742_v36 = vld [vmem:[%s3136_s5 + $0x150] sm:$0xff]  ;;  %v747_v39 = vld [vmem:[%s3136_s5 + $0x178] sm:$0xff] }
  0x61   :  { %v1674_v40 = vpack.c.bf16 %v742_v36, %v740_v35  ;;  %v1676_v41 = vpack.c.bf16 %v747_v39, %v745_v37  ;;  %v852_v35 = vld [vmem:[%s3138_s7 + $0x48] sm:$0xff]  ;;  %v851_v39 = vld [vmem:[%s3138_s7 + $0x40] sm:$0xff] }
  0x62   :  { %1635 = vmatpush1.bf16.msra.mxu0 %v1634_v42  ;;  %v744_v42 = vld [vmem:[%s3136_s5 + $0x160] sm:$0xff]  ;;  %v856_v36 = vld [vmem:[%s3138_s7 + $0x68] sm:$0xff] }
  0x63   :  { %1591 = vmatpush1.bf16.msra.mxu1 %v1590_v47  ;;  %v711_v47 = vld [vmem:[%s3136_s5 + $0x58] sm:$0xff]  ;;  %1637 = vmatprep.subr.bf16.mxu0 %v1636_v43  ;;  %v746_v43 = vld [vmem:[%s3136_s5 + $0x170] sm:$0xff]  ;;  %v1688_v37 = vpack.c.bf16 %v856_v36, %v852_v35 }
  0x64   :  { %1593 = vmatprep.subr.bf16.mxu1 %v1592_v48  ;;  %v1638_v48 = vpack.c.bf16 %v706_v45, %v704_v44  ;;  %v1640_v49 = vpack.c.bf16 %v711_v47, %v709_v46  ;;  %v1678_v44 = vpack.c.bf16 %v746_v43, %v744_v42  ;;  %v164_v47 = vlaneseq  ;;  %v860_v42 = vld [vmem:[%s3138_s7 + $0x88] sm:$0xff] }
  0x65   :  { %v864_v43 = vld [vmem:[%s3138_s7 + $0xa8] sm:$0xff] }
  0x66   :  { %1639 = vmatpush1.bf16.msra.mxu0 %v1638_v48 }
  0x67   :  { %1595 = vmatpush1.bf16.msra.mxu1 %v1594_v53  ;;  %v715_v53 = vld [vmem:[%s3136_s5 + $0x78] sm:$0xff]  ;;  %1641 = vmatprep.subr.bf16.mxu0 %v1640_v49 }
  0x68   :  { %1597 = vmatprep.subr.bf16.mxu1 %v1596_v54  ;;  %v1642_v54 = vpack.c.bf16 %v710_v51, %v708_v50  ;;  %v1644_v55 = vpack.c.bf16 %v715_v53, %v713_v52  ;;  %v2650_v50 = vshrl.u32 %v164_v47, 7  ;;  %v162_v53 = vld [vmem:[%s3133_s2] sm:$0x7] }
  0x6a   :  { %1643 = vmatpush1.bf16.msra.mxu0 %v1642_v54  ;;  %v174_v52 = vsub.s32 2, %v2650_v50  ;;  %v2657_v54 = vsub.s32 0, %v2650_v50 }
  0x6b   :  { %1599 = vmatpush1.bf16.msra.mxu1 %v1598_v59  ;;  %v719_v59 = vld [vmem:[%s3136_s5 + $0x98] sm:$0xff]  ;;  %1645 = vmatprep.subr.bf16.mxu0 %v1644_v55  ;;  %v2660_v55 = vsub.s32 1, %v2650_v50 }
  0x6c   :  { %1601 = vmatprep.subr.bf16.mxu1 %v1600_v60  ;;  %v1646_v60 = vpack.c.bf16 %v714_v57, %v712_v56  ;;  %v1648_v61 = vpack.c.bf16 %v719_v59, %v717_v58  ;;  %v175_v56 = vrot.slane %v162_v53, %v174_v52  ;;  %v167_v57 = vrot.slane %v162_v53, %v2657_v54 }
  0x6d   :  { %v171_v58 = vrot.slane %v162_v53, %v2660_v55  ;;  %v867_v53 = vld [vmem:[%s3138_s7 + $0xc0] sm:$0xff] }
  0x6e   :  { %1647 = vmatpush1.bf16.msra.mxu0 %v1646_v60 }
  0x6f   :  { %1603 = vmatpush1.bf16.msra.mxu1 %v1602_v2  ;;  %v723_v2 = vld [vmem:[%s3136_s5 + $0xb8] sm:$0xff]  ;;  %1649 = vmatprep.subr.bf16.mxu0 %v1648_v61 }
  0x70   :  { %1605 = vmatprep.subr.bf16.mxu1 %v1604_v3  ;;  %v1650_v3 = vpack.c.bf16 %v718_v63, %v716_v62  ;;  %v1652_v4 = vpack.c.bf16 %v723_v2, %v721_v1 }
  0x72   :  { %1651 = vmatpush1.bf16.msra.mxu0 %v1650_v3 }
  0x73   :  { %1607 = vmatpush1.bf16.msra.mxu1 %v1606_v9  ;;  %v727_v9 = vld [vmem:[%s3136_s5 + $0xd8] sm:$0xff]  ;;  %1653 = vmatprep.subr.bf16.mxu0 %v1652_v4 }
  0x74   :  { %1609 = vmatprep.subr.bf16.mxu1 %v1608_v10  ;;  %v1654_v10 = vpack.c.bf16 %v722_v6, %v720_v5  ;;  %v1656_v11 = vpack.c.bf16 %v727_v9, %v725_v8  ;;  %v532_v5 = vld [vmem:[%s3134_s3 + $0x200] sm:$0xff]  ;;  %v534_v6 = vld [vmem:[%s3134_s3 + $0x210] sm:$0xff]  ;;  %v537_v9 = vld [vmem:[%s3134_s3 + $0x228] sm:$0xff] }
  0x76   :  { %1655 = vmatpush1.bf16.msra.mxu0 %v1654_v10  ;;  %v539_v10 = vld [vmem:[%s3134_s3 + $0x238] sm:$0xff] }
  0x77   :  { %1611 = vmatpush1.bf16.msra.mxu1 %v1610_v13  ;;  %v726_v13 = vld [vmem:[%s3136_s5 + $0xd0] sm:$0xff]  ;;  %1657 = vmatprep.subr.bf16.mxu0 %v1656_v11  ;;  %v1628_v14 = vpack.c.bf16 %v539_v10, %v537_v9  ;;  %v896_v9 = vld [vmem:[%s3138_s7 + $0x1a8] sm:$0xff] }
  0x78   :  { %1613 = vmatprep.subr.bf16.mxu1 %v1612_v0  ;;  %v1658_v0 = vpack.c.bf16 %v726_v13, %v724_v12  ;;  %v1626_v12 = vpack.c.bf16 %v534_v6, %v532_v5  ;;  %v887_v5 = vld [vmem:[%s3138_s7 + $0x160] sm:$0xff] }
  0x7a   :  { %1659 = vmatpush1.bf16.msra.mxu0 %v1658_v0  ;;  %v538_v0 = vld [vmem:[%s3134_s3 + $0x230] sm:$0xff] }
  0x7b   :  { %1615 = vmatpush1.bf16.msra.mxu1 %v1614_v18  ;;  %v730_v18 = vld [vmem:[%s3136_s5 + $0xf0] sm:$0xff]  ;;  %1661 = vmatprep.subr.bf16.mxu0 %v1660_v16  ;;  %v1630_v16 = vpack.c.bf16 %v538_v0, %v536_v15  ;;  %v904_v15 = vld [vmem:[%s3138_s7 + $0x1e8] sm:$0xff] }
  0x7c   :  { %1617 = vmatprep.subr.bf16.mxu1 %v1616_v21  ;;  %v1662_v21 = vpack.c.bf16 %v730_v18, %v728_v17  ;;  %v749_v18 = vld [vmem:[%s3136_s5 + $0x188] sm:$0xff] }
  0x7d   :  { %v1680_v20 = vpack.c.bf16 %v751_v19, %v749_v18 }
  0x7e   :  { %1663 = vmatpush1.bf16.msra.mxu0 %v1662_v21  ;;  %v748_v21 = vld [vmem:[%s3136_s5 + $0x180] sm:$0xff] }
  0x7f   :  { %1619 = vmatpush1.bf16.msra.mxu1 %v1618_v24  ;;  %v734_v24 = vld [vmem:[%s3136_s5 + $0x110] sm:$0xff]  ;;  %1665 = vmatprep.subr.bf16.mxu0 %v1664_v22 }
  0x80   :  { %1621 = vmatprep.subr.bf16.mxu1 %v1620_v27  ;;  %v1666_v27 = vpack.c.bf16 %v734_v24, %v732_v23  ;;  %v750_v22 = vld [vmem:[%s3136_s5 + $0x190] sm:$0xff]  ;;  %v753_v24 = vld [vmem:[%s3136_s5 + $0x1a8] sm:$0xff] }
  0x81   :  { %v1682_v23 = vpack.c.bf16 %v750_v22, %v748_v21  ;;  %v845_v22 = vld [vmem:[%s3138_s7 + $0x10] sm:$0xff] }
  0x82   :  { %1667 = vmatpush1.bf16.msra.mxu0 %v1666_v27  ;;  %v848_v27 = vld [vmem:[%s3138_s7 + $0x28] sm:$0xff] }
  0x83   :  { %1623 = vmatpush1.bf16.msra.mxu1 %v1622_v30  ;;  %v738_v30 = vld [vmem:[%s3136_s5 + $0x130] sm:$0xff]  ;;  %1669 = vmatprep.subr.bf16.mxu0 %v1668_v28  ;;  %v846_v28 = vld [vmem:[%s3138_s7 + $0x18] sm:$0xff] }
  0x84   :  { %1625 = vmatprep.subr.bf16.mxu1 %v1624_v33  ;;  %v1670_v33 = vpack.c.bf16 %v738_v30, %v736_v29  ;;  %v1684_v29 = vpack.c.bf16 %v848_v27, %v844_v26  ;;  %v850_v30 = vld [vmem:[%s3138_s7 + $0x38] sm:$0xff] }
  0x85   :  { %v858_v26 = vld [vmem:[%s3138_s7 + $0x78] sm:$0xff] }
  0x86   :  { %1671 = vmatpush1.bf16.msra.mxu0 %v1670_v33  ;;  %v1722_v33 = vpack.c.bf16 %v850_v30, %v846_v28 }
  0x87   :  { %1673 = vmatprep.subr.bf16.mxu0 %v1672_v34  ;;  %v1686_v34 = vpack.c.bf16 %v847_v32, %v843_v31  ;;  %v853_v31 = vld [vmem:[%s3138_s7 + $0x50] sm:$0xff] }
  0x88   :  { %v857_v32 = vld [vmem:[%s3138_s7 + $0x70] sm:$0xff] }
  0x89   :  { %v1728_v35 = vpack.c.bf16 %v857_v32, %v853_v31 }
  0x8a   :  { %1675 = vmatpush1.bf16.msra.mxu0 %v1674_v40  ;;  %v855_v40 = vld [vmem:[%s3138_s7 + $0x60] sm:$0xff] }
  0x8b   :  { %1677 = vmatprep.subr.bf16.mxu0 %v1676_v41  ;;  %v1690_v41 = vpack.c.bf16 %v855_v40, %v851_v39  ;;  %v865_v39 = vld [vmem:[%s3138_s7 + $0xb0] sm:$0xff]  ;;  %v870_v40 = vld [vmem:[%s3138_s7 + $0xd8] sm:$0xff] }
  0x8e   :  { %1679 = vmatpush1.bf16.msra.mxu0 %v1678_v44  ;;  %v1692_v44 = vpack.c.bf16 %v864_v43, %v860_v42 }
  0x8f   :  { %1681 = vmatprep.subr.bf16.mxu0 %v1680_v20 }
  0x92   :  { %1683 = vmatpush1.bf16.msra.mxu0 %v1682_v23  ;;  %v849_v23 = vld [vmem:[%s3138_s7 + $0x30] sm:$0xff] }
  0x93   :  { %822 = vmatprep.subr.mxu0 %v753_v24  ;;  %v1724_v28 = vpack.c.bf16 %v849_v23, %v845_v22  ;;  %v911_v23 = vld [vmem:[%s3138_s7 + $0x220] sm:$0xf] }
  0x96   :  { %823 = vmatpush1.msra.mxu0 %v752_v25  ;;  %v854_v25 = vld [vmem:[%s3138_s7 + $0x58] sm:$0xff] }
  0x97   :  { %1723 = vmatprep.subr.bf16.mxu0 %v1722_v33  ;;  %v1726_v30 = vpack.c.bf16 %v858_v26, %v854_v25  ;;  %v862_v33 = vld [vmem:[%s3138_s7 + $0x98] sm:$0xff] }
  0xe9   :  { %v320_v45 = vpop.f32.mrb[0].mxu1 }
  0xea   :  { %v322_v46 = vpop.f32.mrb[1].mxu1 }
 0x109   :  { %v1370_v48 = vpop.f32.mrb[2].mxu1 }
 0x10a   :  { %v1371_v49 = vpop.f32.mrb[3].mxu1 }
 0x10b   :  { %v1372_v51 = vadd.f32 %v1371_v49, %v1370_v48  ;;  %v868_v48 = vld [vmem:[%s3138_s7 + $0xc8] sm:$0xff] }
 0x10c   :  { %v872_v49 = vld [vmem:[%s3138_s7 + $0xe8] sm:$0xff] }
 0x10d   :  { %v392_v59 = vadd.f32 %v1372_v51, %v175_v56  ;;  %v1696_v51 = vpack.c.bf16 %v872_v49, %v868_v48  ;;  %v871_v56 = vld [vmem:[%s3138_s7 + $0xe0] sm:$0xff] }
 0x117   :  { %v249_v60 = vpop.f32.mrb[0].mxu0 }
 0x118   :  { %v250_v61 = vadd.f32 %v249_v60, %v167_v57  ;;  %v251_v62 = vpop.f32.mrb[1].mxu0  ;;  %v1698_v57 = vpack.c.bf16 %v871_v56, %v867_v53  ;;  %v881_v53 = vld [vmem:[%s3138_s7 + $0x130] sm:$0xff]  ;;  %v886_v56 = vld [vmem:[%s3138_s7 + $0x158] sm:$0xff] }
 0x119   :  { %v461_v63 = vpop.f32.mrb[4].mxu1  ;;  %v252_v1 = vadd.f32 %v251_v62, %v171_v58  ;;  %v876_v58 = vld [vmem:[%s3138_s7 + $0x108] sm:$0xff]  ;;  %v879_v62 = vld [vmem:[%s3138_s7 + $0x120] sm:$0xff] }
 0x11a   :  { %v462_v2 = vadd.f32 %v461_v63, %v392_v59  ;;  %v1435_v3 = vpop.f32.mrb[5].mxu1  ;;  %v321_v4 = vadd.f32 %v320_v45, %v250_v61  ;;  %v859_v45 = vld [vmem:[%s3138_s7 + $0x80] sm:$0xff]  ;;  %v880_v59 = vld [vmem:[%s3138_s7 + $0x128] sm:$0xff] }
 0x11b   :  { %v323_v8 = vadd.f32 %v322_v46, %v252_v1  ;;  %v863_v46 = vld [vmem:[%s3138_s7 + $0xa0] sm:$0xff]  ;;  %v1700_v60 = vpack.c.bf16 %v880_v59, %v876_v58  ;;  %v884_v1 = vld [vmem:[%s3138_s7 + $0x148] sm:$0xff] }
 0x11c   :  { %v465_v13 = vmax.f32 %v321_v4, 0.0  ;;  %v467_v17 = vmax.f32 %v462_v2, 0.0  ;;  %v1694_v47 = vpack.c.bf16 %v863_v46, %v859_v45  ;;  %v875_v61 = vld [vmem:[%s3138_s7 + $0x100] sm:$0xff]  ;;  %v888_v2 = vld [vmem:[%s3138_s7 + $0x168] sm:$0xff]  ;;  %v873_v45 = vld [vmem:[%s3138_s7 + $0xf0] sm:$0xff] }
 0x11d   :  { %v466_v11 = vmax.f32 %v323_v8, 0.0  ;;  %v1702_v63 = vpack.c.bf16 %v879_v62, %v875_v61  ;;  %v1704_v3 = vpack.c.bf16 %v888_v2, %v884_v1  ;;  %v883_v4 = vld [vmem:[%s3138_s7 + $0x140] sm:$0xff]  ;;  %v892_v8 = vld [vmem:[%s3138_s7 + $0x188] sm:$0xff]  ;;  %v878_v46 = vld [vmem:[%s3138_s7 + $0x118] sm:$0xff] }
 0x11e   :  { %v1706_v6 = vpack.c.bf16 %v887_v5, %v883_v4  ;;  %v1708_v10 = vpack.c.bf16 %v896_v9, %v892_v8  ;;  %v889_v61 = vld [vmem:[%s3138_s7 + $0x170] sm:$0xff]  ;;  %v894_v62 = vld [vmem:[%s3138_s7 + $0x198] sm:$0xff] }
 0x11f   :  { %620 = vmatprep.mubr.f32.mxu1 %v466_v11  ;;  %v891_v11 = vld [vmem:[%s3138_s7 + $0x180] sm:$0xff]  ;;  %v897_v4 = vld [vmem:[%s3138_s7 + $0x1b0] sm:$0xff]  ;;  %v902_v5 = vld [vmem:[%s3138_s7 + $0x1d8] sm:$0xff] }
 0x120   :  { %621 = vmatmul.mubr.f32.vlgmr.msra.gmra.mrb[6].mxu1 %v465_v13 }
 0x121   :  { %1627 = vmatpush1.bf16.msra.mxu1 %v1626_v12  ;;  %691 = vmatprep.mubr.f32.mxu1 %v1862_v7  ;;  %v895_v12 = vld [vmem:[%s3138_s7 + $0x1a0] sm:$0xff] }
 0x122   :  { %1629 = vmatprep.subr.bf16.mxu1 %v1628_v14  ;;  %v1710_v13 = vpack.c.bf16 %v895_v12, %v891_v11  ;;  %v900_v14 = vld [vmem:[%s3138_s7 + $0x1c8] sm:$0xff]  ;;  %v903_v11 = vld [vmem:[%s3138_s7 + $0x1e0] sm:$0xff]  ;;  %v901_v12 = vld [vmem:[%s3138_s7 + $0x1d0] sm:$0xff] }
 0x123   :  { %v1712_v0 = vpack.c.bf16 %v904_v15, %v900_v14  ;;  %v905_v14 = vld [vmem:[%s3138_s7 + $0x1f0] sm:$0xff] }
 0x124   :  { %v1752_v15 = vpack.c.bf16 %v905_v14, %v901_v12  ;;  %v1107_v12 = vld [vmem:[%s3140_s9 + $0x38] sm:$0xff]  ;;  %v1125_v14 = vld [vmem:[%s3140_s9 + $0xc8] sm:$0xff] }
 0x125   :  { %1631 = vmatpush1.bf16.msra.mxu1 %v1630_v16  ;;  %v540_v16 = vld [vmem:[%s3135_s4] sm:$0x3] }
 0x126   :  { %1685 = vmatprep.subr.bf16.mxu1 %v1684_v29  ;;  %v549_v18 = vrot.slane %v540_v16, %v2660_v55 }
 0x128   :  { %1327 = vmatmul.mubr.msk.f32.vlgmr.msra.gmra.mrb[6].mxu1 %vm552_vm2, %v467_v17  ;;  %v545_v17 = vrot.slane %v540_v16, %v2657_v54  ;;  %v912_v16 = vld [vmem:[%s3138_s7 + $0x228] sm:$0xf] }
 0x129   :  { %1687 = vmatpush1.bf16.msra.mxu1 %v1686_v34  ;;  %v866_v34 = vld [vmem:[%s3138_s7 + $0xb8] sm:$0xff] }
 0x12a   :  { %1689 = vmatprep.subr.bf16.mxu1 %v1688_v37  ;;  %v1730_v36 = vpack.c.bf16 %v866_v34, %v862_v33  ;;  %v861_v37 = vld [vmem:[%s3138_s7 + $0x90] sm:$0xff]  ;;  %v1132_v34 = vld [vmem:[%s3140_s9 + $0x100] sm:$0xff] }
 0x12b   :  { %v1732_v42 = vpack.c.bf16 %v865_v39, %v861_v37  ;;  %v1133_v37 = vld [vmem:[%s3140_s9 + $0x108] sm:$0xff]  ;;  %v1100_v39 = vld [vmem:[%s3140_s9] sm:$0xff] }
 0x12d   :  { %1691 = vmatpush1.bf16.msra.mxu1 %v1690_v41  ;;  %v874_v41 = vld [vmem:[%s3138_s7 + $0xf8] sm:$0xff] }
 0x12e   :  { %1693 = vmatprep.subr.bf16.mxu1 %v1692_v44  ;;  %v1734_v43 = vpack.c.bf16 %v874_v41, %v870_v40  ;;  %v869_v44 = vld [vmem:[%s3138_s7 + $0xd0] sm:$0xff]  ;;  %v1101_v40 = vld [vmem:[%s3140_s9 + $0x8] sm:$0xff] }
 0x12f   :  { %v1736_v48 = vpack.c.bf16 %v873_v45, %v869_v44  ;;  %v1793_v45 = vpack.c.bf16 %v1133_v37, %v1132_v34  ;;  %v1144_v34 = vld [vmem:[%s3140_s9 + $0x160] sm:$0xff] }
 0x131   :  { %1695 = vmatpush1.bf16.msra.mxu1 %v1694_v47  ;;  %v882_v47 = vld [vmem:[%s3138_s7 + $0x138] sm:$0xff] }
 0x132   :  { %1697 = vmatprep.subr.bf16.mxu1 %v1696_v51  ;;  %v1738_v49 = vpack.c.bf16 %v882_v47, %v878_v46  ;;  %v877_v51 = vld [vmem:[%s3138_s7 + $0x110] sm:$0xff]  ;;  %v1762_v47 = vpack.c.bf16 %v1101_v40, %v1100_v39  ;;  %v1147_v40 = vld [vmem:[%s3140_s9 + $0x178] sm:$0xff] }
 0x133   :  { %v1740_v58 = vpack.c.bf16 %v881_v53, %v877_v51  ;;  %v1134_v46 = vld [vmem:[%s3140_s9 + $0x110] sm:$0xff] }
 0x134   :  { %v1102_v53 = vld [vmem:[%s3140_s9 + $0x10] sm:$0xff] }
 0x135   :  { %1699 = vmatpush1.bf16.msra.mxu1 %v1698_v57  ;;  %v890_v57 = vld [vmem:[%s3138_s7 + $0x178] sm:$0xff]  ;;  %v1146_v39 = vld [vmem:[%s3140_s9 + $0x170] sm:$0xff] }
 0x136   :  { %1701 = vmatprep.subr.bf16.mxu1 %v1700_v60  ;;  %v1742_v59 = vpack.c.bf16 %v890_v57, %v886_v56  ;;  %v885_v60 = vld [vmem:[%s3138_s7 + $0x150] sm:$0xff]  ;;  %v1103_v56 = vld [vmem:[%s3140_s9 + $0x18] sm:$0xff]  ;;  %v1120_v57 = vld [vmem:[%s3140_s9 + $0xa0] sm:$0xff] }
 0x137   :  { %v1744_v1 = vpack.c.bf16 %v889_v61, %v885_v60  ;;  %v1136_v60 = vld [vmem:[%s3140_s9 + $0x120] sm:$0xff]  ;;  %v1766_v61 = vpack.c.bf16 %v1103_v56, %v1102_v53  ;;  %v1153_v56 = vld [vmem:[%s3140_s9 + $0x1a8] sm:$0xff] }
 0x138   :  { %v1152_v53 = vld [vmem:[%s3140_s9 + $0x1a0] sm:$0xff] }
 0x139   :  { %1703 = vmatpush1.bf16.msra.mxu1 %v1702_v63  ;;  %v898_v63 = vld [vmem:[%s3138_s7 + $0x1b8] sm:$0xff] }
 0x13a   :  { %1705 = vmatprep.subr.bf16.mxu1 %v1704_v3  ;;  %v1746_v2 = vpack.c.bf16 %v898_v63, %v894_v62  ;;  %v893_v3 = vld [vmem:[%s3138_s7 + $0x190] sm:$0xff]  ;;  %v1137_v62 = vld [vmem:[%s3140_s9 + $0x128] sm:$0xff] }
 0x13b   :  { %v1748_v8 = vpack.c.bf16 %v897_v4, %v893_v3  ;;  %v1122_v3 = vld [vmem:[%s3140_s9 + $0xb0] sm:$0xff]  ;;  %v1123_v4 = vld [vmem:[%s3140_s9 + $0xb8] sm:$0xff] }
 0x13d   :  { %1707 = vmatpush1.bf16.msra.mxu1 %v1706_v6  ;;  %v906_v6 = vld [vmem:[%s3138_s7 + $0x1f8] sm:$0xff] }
 0x13e   :  { %1709 = vmatprep.subr.bf16.mxu1 %v1708_v10  ;;  %v1750_v9 = vpack.c.bf16 %v906_v6, %v902_v5  ;;  %v899_v10 = vld [vmem:[%s3138_s7 + $0x1c0] sm:$0xff]  ;;  %v1799_v5 = vpack.c.bf16 %v1137_v62, %v1136_v60  ;;  %v1138_v6 = vld [vmem:[%s3140_s9 + $0x130] sm:$0xff] }
 0x13f   :  { %v1114_v60 = vld [vmem:[%s3140_s9 + $0x70] sm:$0xff] }
 0x141   :  { %1711 = vmatpush1.bf16.msra.mxu1 %v1710_v13  ;;  %v1714_v13 = vpack.c.bf16 %v903_v11, %v899_v10  ;;  %v1772_v10 = vpack.c.bf16 %v1123_v4, %v1122_v3  ;;  %v1106_v11 = vld [vmem:[%s3140_s9 + $0x30] sm:$0xff] }
 0x142   :  { %1713 = vmatprep.subr.bf16.mxu1 %v1712_v0  ;;  %v908_v0 = vld [vmem:[%s3138_s7 + $0x208] sm:$0xff] }
 0x145   :  { %1715 = vmatpush1.bf16.msra.mxu1 %v1714_v13  ;;  %v1124_v13 = vld [vmem:[%s3140_s9 + $0xc0] sm:$0xff] }
 0x1fb   :  { %v693_v19 = vpop.f32.mrb[6].mxu1 }
 0x1fc   :  { %v1829_v20 = vadd.f32 %v693_v19, %v545_v17  ;;  %v695_v21 = vpop.f32.mrb[7].mxu1  ;;  %v910_v17 = vld [vmem:[%s3138_s7 + $0x218] sm:$0xff] }
 0x1fd   :  { %v1830_v24 = vadd.f32 %v695_v21, %v549_v18  ;;  %v1716_v18 = vpack.c.bf16 %v912_v16, %v908_v0  ;;  %v914_v19 = vld [vmem:[%s3138_s7 + $0x238] sm:$0xf]  ;;  %v909_v21 = vld [vmem:[%s3138_s7 + $0x210] sm:$0xff]  ;;  %v1140_v0 = vld [vmem:[%s3140_s9 + $0x140] sm:$0xff]  ;;  %v1774_v16 = vpack.c.bf16 %v1107_v12, %v1106_v11 }
 0x1fe   :  { %v698_v29 = vmax.f32 %v1829_v20, 0.0  ;;  %v907_v20 = vld [vmem:[%s3138_s7 + $0x200] sm:$0xff]  ;;  %v1754_v22 = vpack.c.bf16 %v914_v19, %v910_v17  ;;  %v1141_v17 = vld [vmem:[%s3140_s9 + $0x148] sm:$0xff] }
 0x1ff   :  { %v699_v27 = vmax.f32 %v1830_v24, 0.0  ;;  %v913_v24 = vld [vmem:[%s3138_s7 + $0x230] sm:$0xf]  ;;  %1718 = vmatprep.subr.msk.bf16.mxu1 %vm1717_vm6, %v1716_v18  ;;  %v1719_v25 = vpack.c.bf16 %v911_v23, %v907_v20  ;;  %v1776_v18 = vpack.c.bf16 %v1125_v14, %v1124_v13  ;;  %v1108_v19 = vld [vmem:[%s3140_s9 + $0x40] sm:$0xff]  ;;  %v1109_v20 = vld [vmem:[%s3140_s9 + $0x48] sm:$0xff]  ;;  %v1805_v23 = vpack.c.bf16 %v1141_v17, %v1140_v0 }
 0x200   :  { %v1757_v26 = vpack.c.bf16 %v913_v24, %v909_v21  ;;  %v1126_v21 = vld [vmem:[%s3140_s9 + $0xd0] sm:$0xff] }
 0x201   :  { %1328 = vmatprep.mubr.msk.f32.mxu0 %vm766_vm3, %v699_v27  ;;  %1721 = vmatpush1.bf16.msk.msra.mxu1 %vm1717_vm6, %v1719_v25  ;;  %v1116_v27 = vld [vmem:[%s3140_s9 + $0x80] sm:$0xff]  ;;  %v1142_v24 = vld [vmem:[%s3140_s9 + $0x150] sm:$0xff]  ;;  %v1778_v25 = vpack.c.bf16 %v1109_v20, %v1108_v19 }
 0x202   :  { %835 = vmatmul.mubr.f32.vlgmr.msra.gmra.mrb[2].mxu0 %v698_v29 }
 0x203   :  { %1725 = vmatpush1.bf16.msra.mxu0 %v1724_v28  ;;  %v1117_v28 = vld [vmem:[%s3140_s9 + $0x88] sm:$0xff] }
 0x204   :  { %1727 = vmatprep.subr.bf16.mxu0 %v1726_v30  ;;  %v1760_v29 = vpack.c.bf16 %v1117_v28, %v1116_v27  ;;  %v754_v30 = vld [vmem:[%s3137_s6] sm:$0x3]  ;;  %v1110_v28 = vld [vmem:[%s3140_s9 + $0x50] sm:$0xff] }
 0x205   :  { %v759_v31 = vrot.slane %v754_v30, %v2657_v54  ;;  %v763_v32 = vrot.slane %v754_v30, %v2660_v55  ;;  %v1128_v30 = vld [vmem:[%s3140_s9 + $0xe0] sm:$0xff] }
 0x206   :  { %1761 = vmatprep.subr.bf16.mxu1 %v1760_v29  ;;  %v1111_v29 = vld [vmem:[%s3140_s9 + $0x58] sm:$0xff] }
 0x207   :  { %1729 = vmatpush1.bf16.msra.mxu0 %v1728_v35 }
 0x208   :  { %1731 = vmatprep.subr.bf16.mxu0 %v1730_v36 }
 0x20b   :  { %1733 = vmatpush1.bf16.msra.mxu0 %v1732_v42  ;;  %v1118_v42 = vld [vmem:[%s3140_s9 + $0x90] sm:$0xff] }
 0x20c   :  { %1735 = vmatprep.subr.bf16.mxu0 %v1734_v43  ;;  %v1119_v43 = vld [vmem:[%s3140_s9 + $0x98] sm:$0xff] }
 0x20d   :  { %v1764_v51 = vpack.c.bf16 %v1119_v43, %v1118_v42  ;;  %v1148_v42 = vld [vmem:[%s3140_s9 + $0x180] sm:$0xff]  ;;  %v1149_v43 = vld [vmem:[%s3140_s9 + $0x188] sm:$0xff] }
 0x20f   :  { %1737 = vmatpush1.bf16.msra.mxu0 %v1736_v48 }
 0x210   :  { %1739 = vmatprep.subr.bf16.mxu0 %v1738_v49  ;;  %v1135_v49 = vld [vmem:[%s3140_s9 + $0x118] sm:$0xff] }
 0x213   :  { %1741 = vmatpush1.bf16.msra.mxu0 %v1740_v58  ;;  %v1121_v58 = vld [vmem:[%s3140_s9 + $0xa8] sm:$0xff] }
 0x214   :  { %1743 = vmatprep.subr.bf16.mxu0 %v1742_v59  ;;  %v1796_v59 = vpack.c.bf16 %v1135_v49, %v1134_v46  ;;  %v1768_v63 = vpack.c.bf16 %v1121_v58, %v1120_v57  ;;  %v1151_v46 = vld [vmem:[%s3140_s9 + $0x198] sm:$0xff]  ;;  %v1113_v49 = vld [vmem:[%s3140_s9 + $0x68] sm:$0xff]  ;;  %v1823_v57 = vpack.c.bf16 %v1153_v56, %v1152_v53 }
 0x215   :  { %v1131_v58 = vld [vmem:[%s3140_s9 + $0xf8] sm:$0xff] }
 0x217   :  { %1745 = vmatpush1.bf16.msra.mxu0 %v1744_v1  ;;  %v1104_v1 = vld [vmem:[%s3140_s9 + $0x20] sm:$0xff] }
 0x218   :  { %1747 = vmatprep.subr.bf16.mxu0 %v1746_v2  ;;  %v1105_v2 = vld [vmem:[%s3140_s9 + $0x28] sm:$0xff] }
 0x21b   :  { %1749 = vmatpush1.bf16.msra.mxu0 %v1748_v8  ;;  %v1770_v8 = vpack.c.bf16 %v1105_v2, %v1104_v1  ;;  %v915_v1 = vld [vmem:[%s3139_s8] sm:$0xf]  ;;  %v931_v2 = vsub.s32 3, %v2650_v50 }
 0x21c   :  { %1751 = vmatprep.subr.bf16.mxu0 %v1750_v9  ;;  %v1139_v9 = vld [vmem:[%s3140_s9 + $0x138] sm:$0xff]  ;;  %v920_v3 = vrot.slane %v915_v1, %v2657_v54  ;;  %v928_v4 = vrot.slane %v915_v1, %v174_v52  ;;  %v1335_v54 = vld [vmem:[%s3141_s10] ss:$0 sm:$0xff] }
 0x21f   :  { %1753 = vmatpush1.bf16.msra.mxu0 %v1752_v15  ;;  %v1802_v15 = vpack.c.bf16 %v1139_v9, %v1138_v6 }
 0x220   :  { %1756 = vmatprep.subr.msk.bf16.mxu0 %vm1717_vm6, %v1754_v22  ;;  %v1127_v22 = vld [vmem:[%s3140_s9 + $0xd8] sm:$0xff] }
 0x221   :  { %v1780_v27 = vpack.c.bf16 %v1127_v22, %v1126_v21 }
 0x223   :  { %1759 = vmatpush1.bf16.msk.msra.mxu0 %vm1717_vm6, %v1757_v26  ;;  %v1143_v26 = vld [vmem:[%s3140_s9 + $0x158] sm:$0xff] }
 0x224   :  { %1792 = vmatprep.subr.bf16.mxu0 %v1863_v38 }
 0x2d5   :  { %v836_v33 = vpop.f32.mrb[2].mxu0 }
 0x2d6   :  { %v837_v35 = vadd.f32 %v836_v33, %v759_v31  ;;  %v838_v36 = vpop.f32.mrb[3].mxu0  ;;  %v1129_v31 = vld [vmem:[%s3140_s9 + $0xe8] sm:$0xff]  ;;  %v1782_v33 = vpack.c.bf16 %v1111_v29, %v1110_v28 }
 0x2d7   :  { %v839_v41 = vadd.f32 %v838_v36, %v763_v32  ;;  %v1808_v32 = vpack.c.bf16 %v1143_v26, %v1142_v24  ;;  %v1784_v36 = vpack.c.bf16 %v1129_v31, %v1128_v30 }
 0x2d8   :  { %v841_v48 = vmax.f32 %v837_v35, 0.0  ;;  %v1145_v35 = vld [vmem:[%s3140_s9 + $0x168] sm:$0xff] }
 0x2d9   :  { %v842_v44 = vmax.f32 %v839_v41, 0.0  ;;  %v1811_v37 = vpack.c.bf16 %v1145_v35, %v1144_v34  ;;  %v1814_v41 = vpack.c.bf16 %v1147_v40, %v1146_v39 }
 0x2db   :  { %1331 = vmatprep.mubr.msk.f32.mxu1 %vm937_vm7, %v842_v44  ;;  %1334 = vmatprep.mubr.msk.f32.mxu0 %vm937_vm7, %v842_v44  ;;  %v1817_v44 = vpack.c.bf16 %v1149_v43, %v1148_v42 }
 0x2dc   :  { %1019 = vmatmul.mubr.f32.vlgmr.msra.gmra.mrb[8].mxu1 %v841_v48  ;;  %1090 = vmatmul.mubr.f32.vlgmr.msra.gmra.mrb[4].mxu0 %v841_v48  ;;  %v1112_v48 = vld [vmem:[%s3140_s9 + $0x60] sm:$0xff] }
 0x2dd   :  { %1794 = vmatpush1.bf16.msra.mxu0 %v1793_v45  ;;  %1763 = vmatpush3.bf16.msra.mxu1 %v1762_v47  ;;  %v1150_v45 = vld [vmem:[%s3140_s9 + $0x190] sm:$0xff] }
 0x2de   :  { %1795 = vmatprep.subr.bf16.mxu0 %v1863_v38  ;;  %1765 = vmatprep.subr.bf16.mxu1 %v1764_v51  ;;  %v1820_v47 = vpack.c.bf16 %v1151_v46, %v1150_v45  ;;  %v1786_v51 = vpack.c.bf16 %v1113_v49, %v1112_v48 }
 0x2e1   :  { %1797 = vmatpush1.bf16.msra.mxu0 %v1796_v59  ;;  %1767 = vmatpush3.bf16.msra.mxu1 %v1766_v61  ;;  %v1115_v61 = vld [vmem:[%s3140_s9 + $0x78] sm:$0xff] }
 0x2e2   :  { %1798 = vmatprep.subr.bf16.mxu0 %v1863_v38  ;;  %1769 = vmatprep.subr.bf16.mxu1 %v1768_v63  ;;  %v1790_v62 = vpack.c.bf16 %v1115_v61, %v1114_v60  ;;  %v1154_v63 = vld [vmem:[%s3140_s9 + $0x1b0] sm:$0x7] }
 0x2e5   :  { %1800 = vmatpush1.bf16.msra.mxu0 %v1799_v5  ;;  %1771 = vmatpush3.bf16.msra.mxu1 %v1770_v8  ;;  %v932_v5 = vrot.slane %v915_v1, %v931_v2 }
 0x2e6   :  { %1801 = vmatprep.subr.bf16.mxu0 %v1863_v38  ;;  %1773 = vmatprep.subr.bf16.mxu1 %v1772_v10 }
 0x2e9   :  { %1803 = vmatpush1.bf16.msra.mxu0 %v1802_v15  ;;  %1775 = vmatpush3.bf16.msra.mxu1 %v1774_v16 }
 0x2ea   :  { %1804 = vmatprep.subr.bf16.mxu0 %v1863_v38  ;;  %1777 = vmatprep.subr.bf16.mxu1 %v1776_v18 }
 0x2ed   :  { %1806 = vmatpush1.bf16.msra.mxu0 %v1805_v23  ;;  %1779 = vmatpush3.bf16.msra.mxu1 %v1778_v25 }
 0x2ee   :  { %1807 = vmatprep.subr.bf16.mxu0 %v1863_v38  ;;  %1781 = vmatprep.subr.bf16.mxu1 %v1780_v27 }
 0x2f1   :  { %1809 = vmatpush1.bf16.msra.mxu0 %v1808_v32  ;;  %1783 = vmatpush3.bf16.msra.mxu1 %v1782_v33 }
 0x2f2   :  { %1810 = vmatprep.subr.bf16.mxu0 %v1863_v38  ;;  %1785 = vmatprep.subr.bf16.mxu1 %v1784_v36 }
 0x2f5   :  { %1812 = vmatpush1.bf16.msra.mxu0 %v1811_v37  ;;  %1787 = vmatpush3.bf16.msra.mxu1 %v1786_v51 }
 0x2f6   :  { %1813 = vmatprep.subr.bf16.mxu0 %v1863_v38 }
 0x2f9   :  { %1815 = vmatpush1.bf16.msra.mxu0 %v1814_v41 }
 0x2fa   :  { %1816 = vmatprep.subr.bf16.mxu0 %v1863_v38 }
 0x2fd   :  { %1818 = vmatpush1.bf16.msra.mxu0 %v1817_v44 }
 0x2fe   :  { %1819 = vmatprep.subr.bf16.mxu0 %v1863_v38 }
 0x301   :  { %1821 = vmatpush1.bf16.msra.mxu0 %v1820_v47 }
 0x302   :  { %1822 = vmatprep.subr.bf16.mxu0 %v1863_v38  ;;  %v1130_v38 = vld [vmem:[%s3140_s9 + $0xf0] sm:$0xff] }
 0x303   :  { %v1788_v59 = vpack.c.bf16 %v1131_v58, %v1130_v38 }
 0x305   :  { %1824 = vmatpush1.bf16.msra.mxu0 %v1823_v57  ;;  %1789 = vmatprep.subr.bf16.mxu1 %v1788_v59 }
 0x306   :  { %1284 = vmatprep.subr.mxu0 %v1862_v7  ;;  %1791 = vmatpush3.bf16.msra.mxu1 %v1790_v62  ;;  %v924_v7 = vrot.slane %v915_v1, %v2660_v55 }
 0x309   :  { %1336 = vmatpush1.msk.msra.mxu0 %vm1166_vm8, %v1154_v63 }
 0x3af   :  { %v1020_v6 = vpop.f32.mrb[8].mxu1  ;;  %v1091_v8 = vpop.f32.mrb[4].mxu0 }
 0x3b0   :  { %v1021_v9 = vadd.f32 %v1020_v6, %v920_v3  ;;  %v1092_v10 = vadd.f32 %v1091_v8, %v928_v4  ;;  %v1022_v11 = vpop.f32.mrb[9].mxu1  ;;  %v1093_v12 = vpop.f32.mrb[5].mxu0 }
 0x3b1   :  { %v1023_v13 = vadd.f32 %v1022_v11, %v924_v7  ;;  %v1094_v14 = vadd.f32 %v1093_v12, %v932_v5 }
 0x3b2   :  { %v1096_v16 = vmax.f32 %v1021_v9, 0.0  ;;  %v1098_v17 = vmax.f32 %v1092_v10, 0.0 }
 0x3b3   :  { %v1097_v15 = vmax.f32 %v1023_v13, 0.0  ;;  %v1099_v0 = vmax.f32 %v1094_v14, 0.0 }
 0x3b5   :  { %1234 = vmatprep.mubr.f32.mxu1 %v1097_v15  ;;  %1337 = vmatprep.mubr.msk.f32.mxu0 %vm1162_vm9, %v1099_v0 }
 0x3b6   :  { %1235 = vmatmul.mubr.f32.vlgmr.msra.gmra.mrb[10].mxu1 %v1096_v16  ;;  %1305 = vmatmul.mubr.f32.vlgmr.msra.gmra.mrb[6].mxu0 %v1098_v17 }
 0x489   :  { %v1414_v50 = vpop.f32.mrb[10].mxu1  ;;  %v1306_v52 = vpop.f32.mrb[6].mxu0 }
 0x48a   :  { %v1415_v55 = vpop.f32.mrb[11].mxu1  ;;  %v1308_v18 = vpop.f32.mrb[7].mxu0 }
 0x48b   :  { %v1416_v19 = vadd.f32 %v1415_v55, %v1414_v50 }
 0x48d   :  { %v1237_v20 = vadd.f32 %v1416_v19, %v1335_v54 }
 0x48f   :  { %v1307_v21 = vadd.f32 %v1306_v52, %v1237_v20 }
 0x491   :  { %1310 = vst.msk [vmem:[#allocation2] sm:$0xff] %vm552_vm2, %v1307_v21 }
 0x492   :  { %1849 = shalt.err (!%p1846_p4)
}
 0x493   :  { %s1850_s10 = scalar_lea.hbm %s3142_s11, 128 }
 0x494   :  { %p1851_p5 = scmp.ne.s32.totalorder %s3142_s11, %s1850_s10  ;;  %p1854_p6 = scmp.lt.u32.totalorder %s1850_s10, %s3142_s11 }
 0x496   :  { %p1856_p7 = pnand %p1854_p6, %p1851_p5 }
 0x498   :  { %1859 = shalt.err (!%p1856_p7)
}
 0x499   :  { %1320 = dma.vmem_to_hbm [thread:$0]  %s1318_s17, 128, %s3142_s11, [#allocation3]  }
 0x49a   :  { %1860 = dma.done.wait [#allocation3], 128  }
 0x49b   :  { %1861 = vsyncadd [#allocation3], 4294967168 }
 0x49c   :  { %1324 = vsyncpa [#allocation3], 1 }

</bundles_post_ra>
